<compile_context>
chip_gen: v5e
topology: v5e:2x2
jax: 0.10.0
libtpu: 0.0.40
codegen_flags: <defaults>
</compile_context>

<pallas_src>
import functools

import jax
import jax.numpy as jnp
import numpy as np
from jax import lax
from jax.experimental import pallas as pl
from jax.experimental.pallas import tpu as pltpu


def encoder_layer_kernel(x_ref, pos_ref, wqkv_ref, bqkv_ref, wo_ref, bo_ref,
                         w1_ref, b1_ref, w2_ref, b2_ref, out_ref, ctx_ref,
                         *, nhead, head_dim):
    """One grid step = one batch element; all refs are 2D, lane-dense."""
    f32 = jnp.float32
    bf16 = jnp.bfloat16
    nt = (((1,), (1,)), ((), ()))           # contract last dims of both operands (NT matmul)
    D = nhead * head_dim

    x = x_ref[...] + pos_ref[...]           # (S, D) f32 residual stream: queries + pos_emb

    # --- fused QKV projection: single (S,D)@(D,3D) MXU matmul, bias add in f32 ---
    qkv = jnp.dot(x.astype(bf16), wqkv_ref[...], preferred_element_type=f32) + bqkv_ref[...]
    qkv_bf = qkv.astype(bf16)               # one cast of the whole (S,3D) slab

    # --- per-head attention; contexts land straight in the (S,D) out-proj input scratch ---
    # NOTE: static Python loop (not fori_loop) because the lane offsets h*head_dim must be
    # compile-time constants; the per-iteration live set is only (p, ctx) since q/k/v are
    # slices of the single resident qkv value and ctx goes straight to VMEM scratch.
    for h in range(nhead):
        q_h = qkv_bf[:, h * head_dim:(h + 1) * head_dim]                 # (S, hd), scale pre-folded
        k_h = qkv_bf[:, D + h * head_dim:D + (h + 1) * head_dim]         # (S, hd)
        v_h = qkv_bf[:, 2 * D + h * head_dim:2 * D + (h + 1) * head_dim]  # (S, hd)

        s = lax.dot_general(q_h, k_h, nt, preferred_element_type=f32)    # (S, S) f32
        s = s - jnp.max(s, axis=-1, keepdims=True)
        p = jnp.exp(s)
        p = p * pl.reciprocal(jnp.sum(p, axis=-1, keepdims=True), approx=True)   # softmax (f32)

        ctx = jnp.dot(p.astype(bf16), v_h, preferred_element_type=f32)   # (S, hd)
        ctx_ref[:, h * head_dim:(h + 1) * head_dim] = ctx.astype(bf16)

    # --- single full-width out-projection + residual (dropout1/norm1 identity) ---
    attn = jnp.dot(ctx_ref[...], wo_ref[...], preferred_element_type=f32) + bo_ref[...]
    x1 = x + attn

    # --- feed-forward (weights pre-transposed: x @ W), relu in f32 ---
    h1 = jnp.dot(x1.astype(bf16), w1_ref[...], preferred_element_type=f32) + b1_ref[...]
    h1 = jnp.maximum(h1, 0.0)
    ff = jnp.dot(h1.astype(bf16), w2_ref[...], preferred_element_type=f32) + b2_ref[...]

    # dropout2 / norm2 are identity (eval mode, norm=False)
    out_ref[...] = (x1 + ff).astype(out_ref.dtype)


def _prep_params(params, d_model, nhead):
    """One-time layout plumbing: transpose weights, fold the query scale (in f32), cast to bf16."""
    D = d_model
    hd = D // nhead
    f32, bf16 = jnp.float32, jnp.bfloat16
    scale = 1.0 / float(np.sqrt(hd))

    # Fused in-projection: PyTorch stores (3D, D) = [Wq; Wk; Wv] with out_features first.
    wqkv_t = params["wqkv"].astype(f32).T                     # (D, 3D): x @ wqkv_t == in_proj(x)
    bqkv = params["bqkv"].astype(f32).reshape(1, 3 * D)
    scale_vec = jnp.concatenate([jnp.full((D,), scale, f32), jnp.ones((2 * D,), f32)])
    wqkv_t = wqkv_t * scale_vec[None, :]                      # fold 1/sqrt(hd) into Q columns (f32)
    bqkv = bqkv * scale_vec[None, :]

    return dict(
        wqkv=wqkv_t.astype(bf16), bqkv=bqkv,
        wo=params["wo"].astype(f32).T.astype(bf16),           # (D, D)
        bo=params["bo"].astype(f32).reshape(1, D),
        w1=params["w1"].astype(f32).T.astype(bf16),           # (D, FF)
        b1=params["b1"].astype(f32).reshape(1, -1),
        w2=params["w2"].astype(f32).T.astype(bf16),           # (FF, D)
        b2=params["b2"].astype(f32).reshape(1, D),
    )


def _pick_vmem_limit():
    """Per-generation VMEM budget (v5e/v6e: 128 MiB physical, v7x: 64 MiB)."""
    phys = None
    try:
        phys = getattr(pltpu.get_tpu_info(), "vmem_capacity_bytes", None)
    except Exception:
        phys = None
    if phys is None:
        return 52 * 1024 * 1024            # safe on every generation (fits v7x's 64 MiB)
    headroom = 12 * 1024 * 1024
    return int(min(max(phys - headroom, 32 * 1024 * 1024), 110 * 1024 * 1024))


def transformer_encoder_layer(queries, pos_emb, params, *, nhead, single_buffer_weights=True):
    """queries, pos_emb: (S, B, D) float32 with D % 128 == 0. Returns (S, B, D)."""
    S, B, D = queries.shape
    assert D % nhead == 0, "d_model must be divisible by nhead"
    assert D % 128 == 0, "d_model must be a multiple of 128 (module default 1024 qualifies)"
    hd = D // nhead
    FF = params["w1"].shape[0]

    prep = _prep_params(params, D, nhead)

    # Free reshapes (merge trailing dims) — no HBM transposes; batch b lives in lanes [b*D,(b+1)*D).
    x_flat = queries.reshape(S, B * D)
    pos_flat = pos_emb.reshape(S, B * D)

    kernel = functools.partial(encoder_layer_kernel, nhead=nhead, head_dim=hd)

    def _call(single_buffer):
        def const_spec(shape):
            # Grid-invariant operand: constant index_map; single-buffer to halve its footprint.
            if single_buffer:
                return pl.BlockSpec(shape, lambda b: (0, 0), pipeline_mode=pl.Buffered(1))
            return pl.BlockSpec(shape, lambda b: (0, 0))

        return pl.pallas_call(
            kernel,
            out_shape=jax.ShapeDtypeStruct((S, B * D), queries.dtype),
            grid_spec=pltpu.PrefetchScalarGridSpec(
                num_scalar_prefetch=0,
                grid=(B,),
                in_specs=[
                    pl.BlockSpec((S, D), lambda b: (0, b)),     # x      (lane block = batch b)
                    pl.BlockSpec((S, D), lambda b: (0, b)),     # pos_emb
                    const_spec((D, 3 * D)),                     # Wqkv  (pre-T, Q-scaled, bf16)
                    const_spec((1, 3 * D)),                     # bqkv  (Q-scaled, f32)
                    const_spec((D, D)),                         # Wo    (pre-T, bf16)
                    const_spec((1, D)),                         # bo
                    const_spec((D, FF)),                        # W1    (pre-T, bf16)
                    const_spec((1, FF)),                        # b1
                    const_spec((FF, D)),                        # W2    (pre-T, bf16)
                    const_spec((1, D)),                         # b2
                ],
                out_specs=pl.BlockSpec((S, D), lambda b: (0, b)),
                scratch_shapes=[pltpu.VMEM((S, D), jnp.bfloat16)],   # per-batch head contexts
            ),
            compiler_params=pltpu.CompilerParams(
                dimension_semantics=("parallel",),
                vmem_limit_bytes=_pick_vmem_limit(),
            ),
        )(x_flat, pos_flat, prep["wqkv"], prep["bqkv"], prep["wo"], prep["bo"],
          prep["w1"], prep["b1"], prep["w2"], prep["b2"])

    if single_buffer_weights:
        try:
            out_flat = _call(True)
        except Exception:
            # Installed Pallas rejects pipeline_mode / Buffered(1): fall back to default buffering.
            out_flat = _call(False)
    else:
        out_flat = _call(False)

    return out_flat.reshape(S, B, D)       # free reshape back to (S, B, D)


def reference_forward(queries, pos_emb, params, *, nhead):
    """Pure-JAX f32 reference mirroring the PyTorch forward (eval mode)."""
    S, B, D = queries.shape
    hd = D // nhead
    x = queries + pos_emb
    qkv = jnp.einsum("sbd,ed->sbe", x, params["wqkv"]) + params["bqkv"][0]
    q, k, v = qkv[..., :D], qkv[..., D:2 * D], qkv[..., 2 * D:]
    qh = q.reshape(S, B, nhead, hd) / np.sqrt(hd)
    kh = k.reshape(S, B, nhead, hd)
    vh = v.reshape(S, B, nhead, hd)
    s = jnp.einsum("qbhd,kbhd->bhqk", qh, kh)
    p = jax.nn.softmax(s, axis=-1)
    attn = jnp.einsum("bhqk,kbhd->qbhd", p, vh).reshape(S, B, D)
    attn_out = jnp.einsum("sbf,df->sbd", attn, params["wo"]) + params["bo"][0]
    x1 = x + attn_out
    h1 = jax.nn.relu(jnp.einsum("sbd,fd->sbf", x1, params["w1"]) + params["b1"][0])
    ff = jnp.einsum("sbf,df->sbd", h1, params["w2"]) + params["b2"][0]
    return x1 + ff


if __name__ == "__main__":
    # Small shapes consistent with the module (d_model default 1024 is a multiple of 128;
    # the demo uses D=128 so the per-batch lane-block layout stays legal and lane-dense).
    S, B, D, NHEAD, FF = 16, 2, 128, 4, 256

    key = jax.random.PRNGKey(0)
    keys = jax.random.split(key, 10)
    scale = 0.05

    params = {
        "wqkv": scale * jax.random.normal(keys[0], (3 * D, D), jnp.float32),
        "bqkv": scale * jax.random.normal(keys[1], (1, 3 * D), jnp.float32),
        "wo":   scale * jax.random.normal(keys[2], (D, D), jnp.float32),
        "bo":   scale * jax.random.normal(keys[3], (1, D), jnp.float32),
        "w1":   scale * jax.random.normal(keys[4], (FF, D), jnp.float32),
        "b1":   scale * jax.random.normal(keys[5], (1, FF), jnp.float32),
        "w2":   scale * jax.random.normal(keys[6], (D, FF), jnp.float32),
        "b2":   scale * jax.random.normal(keys[7], (1, D), jnp.float32),
    }

    queries = jax.random.normal(keys[8], (S, B, D), jnp.float32)
    pos_emb = 0.1 * jax.random.normal(keys[9], (S, B, D), jnp.float32)

    out = transformer_encoder_layer(queries, pos_emb, params, nhead=NHEAD)
    out = jax.block_until_ready(out)

    ref = reference_forward(queries, pos_emb, params, nhead=NHEAD)
    np.testing.assert_allclose(np.asarray(out), np.asarray(ref), atol=2.5e-2, rtol=2.5e-2)

    print("KERNEL_OK")
</pallas_src>

<mosaic_0001>
module attributes {stable_mosaic.version = 11 : i64} {
  func.func @encoder_layer_kernel(%arg0: i32, %arg1: memref<16x128xf32, #tpu.memory_space<vmem>>, %arg2: memref<16x128xf32, #tpu.memory_space<vmem>>, %arg3: memref<128x384xbf16, #tpu.memory_space<vmem>>, %arg4: memref<1x384xf32, #tpu.memory_space<vmem>>, %arg5: memref<128x128xbf16, #tpu.memory_space<vmem>>, %arg6: memref<1x128xf32, #tpu.memory_space<vmem>>, %arg7: memref<128x256xbf16, #tpu.memory_space<vmem>>, %arg8: memref<1x256xf32, #tpu.memory_space<vmem>>, %arg9: memref<256x128xbf16, #tpu.memory_space<vmem>>, %arg10: memref<1x128xf32, #tpu.memory_space<vmem>>, %arg11: memref<16x128xf32, #tpu.memory_space<vmem>>, %arg12: memref<16x128xbf16, #tpu.memory_space<vmem>>) attributes {dimension_semantics = [#tpu.dimension_semantics<parallel>], iteration_bounds = array<i64: 2>, scalar_prefetch = 0 : i64, scratch_operands = 1 : i64, tpu.core_type = #tpu.core_type<tc>, window_params = [{transform_indices = @transform_0, window_bounds = array<i64: 16, 128>}, {transform_indices = @transform_1, window_bounds = array<i64: 16, 128>}, {pipeline_mode = #tpu.pipeline_mode<synchronous>, transform_indices = @transform_2, window_bounds = array<i64: 128, 384>}, {pipeline_mode = #tpu.pipeline_mode<synchronous>, transform_indices = @transform_3, window_bounds = array<i64: 1, 384>}, {pipeline_mode = #tpu.pipeline_mode<synchronous>, transform_indices = @transform_4, window_bounds = array<i64: 128, 128>}, {pipeline_mode = #tpu.pipeline_mode<synchronous>, transform_indices = @transform_5, window_bounds = array<i64: 1, 128>}, {pipeline_mode = #tpu.pipeline_mode<synchronous>, transform_indices = @transform_6, window_bounds = array<i64: 128, 256>}, {pipeline_mode = #tpu.pipeline_mode<synchronous>, transform_indices = @transform_7, window_bounds = array<i64: 1, 256>}, {pipeline_mode = #tpu.pipeline_mode<synchronous>, transform_indices = @transform_8, window_bounds = array<i64: 256, 128>}, {pipeline_mode = #tpu.pipeline_mode<synchronous>, transform_indices = @transform_9, window_bounds = array<i64: 1, 128>}, {transform_indices = @transform_10, window_bounds = array<i64: 16, 128>}]} {
    %c0 = arith.constant 0 : index
    %c0_0 = arith.constant 0 : index
    %0 = vector.load %arg1[%c0, %c0_0] : memref<16x128xf32, #tpu.memory_space<vmem>>, vector<16x128xf32>
    %c0_1 = arith.constant 0 : index
    %c0_2 = arith.constant 0 : index
    %1 = vector.load %arg2[%c0_1, %c0_2] : memref<16x128xf32, #tpu.memory_space<vmem>>, vector<16x128xf32>
    %2 = arith.addf %0, %1 : vector<16x128xf32>
    %3 = arith.truncf %2 : vector<16x128xf32> to vector<16x128xbf16>
    %c0_3 = arith.constant 0 : index
    %c0_4 = arith.constant 0 : index
    %4 = vector.load %arg3[%c0_3, %c0_4] : memref<128x384xbf16, #tpu.memory_space<vmem>>, vector<128x384xbf16>
    %cst = arith.constant dense<0.000000e+00> : vector<16x384xf32>
    %5 = tpu.matmul %3, %4, %cst {dimension_numbers = #tpu.dot_dimension_numbers<[1], [0], [0], [1], [0, 0, 1, 1], [], []>} : vector<16x128xbf16>, vector<128x384xbf16>, vector<16x384xf32> -> vector<16x384xf32>
    %c0_5 = arith.constant 0 : index
    %c0_6 = arith.constant 0 : index
    %6 = vector.load %arg4[%c0_5, %c0_6] : memref<1x384xf32, #tpu.memory_space<vmem>>, vector<1x384xf32>
    %7 = vector.broadcast %6 : vector<1x384xf32> to vector<16x384xf32>
    %8 = arith.addf %5, %7 : vector<16x384xf32>
    %9 = arith.truncf %8 : vector<16x384xf32> to vector<16x384xbf16>
    %10 = vector.extract_strided_slice %9 {offsets = [0, 0], sizes = [16, 32], strides = [1, 1]} : vector<16x384xbf16> to vector<16x32xbf16>
    %11 = vector.extract_strided_slice %9 {offsets = [0, 128], sizes = [16, 32], strides = [1, 1]} : vector<16x384xbf16> to vector<16x32xbf16>
    %12 = vector.extract_strided_slice %9 {offsets = [0, 256], sizes = [16, 32], strides = [1, 1]} : vector<16x384xbf16> to vector<16x32xbf16>
    %cst_7 = arith.constant dense<0.000000e+00> : vector<16x16xf32>
    %13 = tpu.matmul %10, %11, %cst_7 {dimension_numbers = #tpu.dot_dimension_numbers<[1], [1], [0], [0], [0, 0, 1, 0], [], []>} : vector<16x32xbf16>, vector<16x32xbf16>, vector<16x16xf32> -> vector<16x16xf32>
    %cst_8 = arith.constant dense<0xFF800000> : vector<16xf32>
    %14 = vector.multi_reduction <maximumf>, %13, %cst_8 [1] : vector<16x16xf32> to vector<16xf32>
    %15 = vector.shape_cast %14 : vector<16xf32> to vector<16x1xf32>
    %16 = vector.broadcast %15 : vector<16x1xf32> to vector<16x16xf32>
    %17 = arith.subf %13, %16 : vector<16x16xf32>
    %18 = math.exp %17 : vector<16x16xf32>
    %cst_9 = arith.constant dense<0.000000e+00> : vector<16xf32>
    %19 = vector.multi_reduction <add>, %18, %cst_9 [1] : vector<16x16xf32> to vector<16xf32>
    %20 = vector.shape_cast %19 : vector<16xf32> to vector<16x1xf32>
    %21 = tpu.reciprocal %20 {approx = true} : vector<16x1xf32> -> vector<16x1xf32>
    %22 = vector.broadcast %21 : vector<16x1xf32> to vector<16x16xf32>
    %23 = arith.mulf %18, %22 : vector<16x16xf32>
    %24 = arith.truncf %23 : vector<16x16xf32> to vector<16x16xbf16>
    %cst_10 = arith.constant dense<0.000000e+00> : vector<16x32xf32>
    %25 = tpu.matmul %24, %12, %cst_10 {dimension_numbers = #tpu.dot_dimension_numbers<[1], [0], [0], [1], [0, 0, 1, 1], [], []>} : vector<16x16xbf16>, vector<16x32xbf16>, vector<16x32xf32> -> vector<16x32xf32>
    %26 = arith.truncf %25 : vector<16x32xf32> to vector<16x32xbf16>
    %c0_11 = arith.constant 0 : index
    %c0_12 = arith.constant 0 : index
    %27 = vector.load %arg12[%c0_11, %c0_12] : memref<16x128xbf16, #tpu.memory_space<vmem>>, vector<16x32xbf16>
    tpu.vector_store %arg12[%c0_11, %c0_12], %26 {strides = array<i32>} : memref<16x128xbf16, #tpu.memory_space<vmem>>, vector<16x32xbf16>,
    %28 = vector.extract_strided_slice %9 {offsets = [0, 32], sizes = [16, 32], strides = [1, 1]} : vector<16x384xbf16> to vector<16x32xbf16>
    %29 = vector.extract_strided_slice %9 {offsets = [0, 160], sizes = [16, 32], strides = [1, 1]} : vector<16x384xbf16> to vector<16x32xbf16>
    %30 = vector.extract_strided_slice %9 {offsets = [0, 288], sizes = [16, 32], strides = [1, 1]} : vector<16x384xbf16> to vector<16x32xbf16>
    %cst_13 = arith.constant dense<0.000000e+00> : vector<16x16xf32>
    %31 = tpu.matmul %28, %29, %cst_13 {dimension_numbers = #tpu.dot_dimension_numbers<[1], [1], [0], [0], [0, 0, 1, 0], [], []>} : vector<16x32xbf16>, vector<16x32xbf16>, vector<16x16xf32> -> vector<16x16xf32>
    %cst_14 = arith.constant dense<0xFF800000> : vector<16xf32>
    %32 = vector.multi_reduction <maximumf>, %31, %cst_14 [1] : vector<16x16xf32> to vector<16xf32>
    %33 = vector.shape_cast %32 : vector<16xf32> to vector<16x1xf32>
    %34 = vector.broadcast %33 : vector<16x1xf32> to vector<16x16xf32>
    %35 = arith.subf %31, %34 : vector<16x16xf32>
    %36 = math.exp %35 : vector<16x16xf32>
    %cst_15 = arith.constant dense<0.000000e+00> : vector<16xf32>
    %37 = vector.multi_reduction <add>, %36, %cst_15 [1] : vector<16x16xf32> to vector<16xf32>
    %38 = vector.shape_cast %37 : vector<16xf32> to vector<16x1xf32>
    %39 = tpu.reciprocal %38 {approx = true} : vector<16x1xf32> -> vector<16x1xf32>
    %40 = vector.broadcast %39 : vector<16x1xf32> to vector<16x16xf32>
    %41 = arith.mulf %36, %40 : vector<16x16xf32>
    %42 = arith.truncf %41 : vector<16x16xf32> to vector<16x16xbf16>
    %cst_16 = arith.constant dense<0.000000e+00> : vector<16x32xf32>
    %43 = tpu.matmul %42, %30, %cst_16 {dimension_numbers = #tpu.dot_dimension_numbers<[1], [0], [0], [1], [0, 0, 1, 1], [], []>} : vector<16x16xbf16>, vector<16x32xbf16>, vector<16x32xf32> -> vector<16x32xf32>
    %44 = arith.truncf %43 : vector<16x32xf32> to vector<16x32xbf16>
    %c0_17 = arith.constant 0 : index
    %c32 = arith.constant 32 : index
    %45 = vector.load %arg12[%c0_17, %c32] : memref<16x128xbf16, #tpu.memory_space<vmem>>, vector<16x32xbf16>
    tpu.vector_store %arg12[%c0_17, %c32], %44 {strides = array<i32>} : memref<16x128xbf16, #tpu.memory_space<vmem>>, vector<16x32xbf16>,
    %46 = vector.extract_strided_slice %9 {offsets = [0, 64], sizes = [16, 32], strides = [1, 1]} : vector<16x384xbf16> to vector<16x32xbf16>
    %47 = vector.extract_strided_slice %9 {offsets = [0, 192], sizes = [16, 32], strides = [1, 1]} : vector<16x384xbf16> to vector<16x32xbf16>
    %48 = vector.extract_strided_slice %9 {offsets = [0, 320], sizes = [16, 32], strides = [1, 1]} : vector<16x384xbf16> to vector<16x32xbf16>
    %cst_18 = arith.constant dense<0.000000e+00> : vector<16x16xf32>
    %49 = tpu.matmul %46, %47, %cst_18 {dimension_numbers = #tpu.dot_dimension_numbers<[1], [1], [0], [0], [0, 0, 1, 0], [], []>} : vector<16x32xbf16>, vector<16x32xbf16>, vector<16x16xf32> -> vector<16x16xf32>
    %cst_19 = arith.constant dense<0xFF800000> : vector<16xf32>
    %50 = vector.multi_reduction <maximumf>, %49, %cst_19 [1] : vector<16x16xf32> to vector<16xf32>
    %51 = vector.shape_cast %50 : vector<16xf32> to vector<16x1xf32>
    %52 = vector.broadcast %51 : vector<16x1xf32> to vector<16x16xf32>
    %53 = arith.subf %49, %52 : vector<16x16xf32>
    %54 = math.exp %53 : vector<16x16xf32>
    %cst_20 = arith.constant dense<0.000000e+00> : vector<16xf32>
    %55 = vector.multi_reduction <add>, %54, %cst_20 [1] : vector<16x16xf32> to vector<16xf32>
    %56 = vector.shape_cast %55 : vector<16xf32> to vector<16x1xf32>
    %57 = tpu.reciprocal %56 {approx = true} : vector<16x1xf32> -> vector<16x1xf32>
    %58 = vector.broadcast %57 : vector<16x1xf32> to vector<16x16xf32>
    %59 = arith.mulf %54, %58 : vector<16x16xf32>
    %60 = arith.truncf %59 : vector<16x16xf32> to vector<16x16xbf16>
    %cst_21 = arith.constant dense<0.000000e+00> : vector<16x32xf32>
    %61 = tpu.matmul %60, %48, %cst_21 {dimension_numbers = #tpu.dot_dimension_numbers<[1], [0], [0], [1], [0, 0, 1, 1], [], []>} : vector<16x16xbf16>, vector<16x32xbf16>, vector<16x32xf32> -> vector<16x32xf32>
    %62 = arith.truncf %61 : vector<16x32xf32> to vector<16x32xbf16>
    %c0_22 = arith.constant 0 : index
    %c64 = arith.constant 64 : index
    %63 = vector.load %arg12[%c0_22, %c64] : memref<16x128xbf16, #tpu.memory_space<vmem>>, vector<16x32xbf16>
    tpu.vector_store %arg12[%c0_22, %c64], %62 {strides = array<i32>} : memref<16x128xbf16, #tpu.memory_space<vmem>>, vector<16x32xbf16>,
    %64 = vector.extract_strided_slice %9 {offsets = [0, 96], sizes = [16, 32], strides = [1, 1]} : vector<16x384xbf16> to vector<16x32xbf16>
    %65 = vector.extract_strided_slice %9 {offsets = [0, 224], sizes = [16, 32], strides = [1, 1]} : vector<16x384xbf16> to vector<16x32xbf16>
    %66 = vector.extract_strided_slice %9 {offsets = [0, 352], sizes = [16, 32], strides = [1, 1]} : vector<16x384xbf16> to vector<16x32xbf16>
    %cst_23 = arith.constant dense<0.000000e+00> : vector<16x16xf32>
    %67 = tpu.matmul %64, %65, %cst_23 {dimension_numbers = #tpu.dot_dimension_numbers<[1], [1], [0], [0], [0, 0, 1, 0], [], []>} : vector<16x32xbf16>, vector<16x32xbf16>, vector<16x16xf32> -> vector<16x16xf32>
    %cst_24 = arith.constant dense<0xFF800000> : vector<16xf32>
    %68 = vector.multi_reduction <maximumf>, %67, %cst_24 [1] : vector<16x16xf32> to vector<16xf32>
    %69 = vector.shape_cast %68 : vector<16xf32> to vector<16x1xf32>
    %70 = vector.broadcast %69 : vector<16x1xf32> to vector<16x16xf32>
    %71 = arith.subf %67, %70 : vector<16x16xf32>
    %72 = math.exp %71 : vector<16x16xf32>
    %cst_25 = arith.constant dense<0.000000e+00> : vector<16xf32>
    %73 = vector.multi_reduction <add>, %72, %cst_25 [1] : vector<16x16xf32> to vector<16xf32>
    %74 = vector.shape_cast %73 : vector<16xf32> to vector<16x1xf32>
    %75 = tpu.reciprocal %74 {approx = true} : vector<16x1xf32> -> vector<16x1xf32>
    %76 = vector.broadcast %75 : vector<16x1xf32> to vector<16x16xf32>
    %77 = arith.mulf %72, %76 : vector<16x16xf32>
    %78 = arith.truncf %77 : vector<16x16xf32> to vector<16x16xbf16>
    %cst_26 = arith.constant dense<0.000000e+00> : vector<16x32xf32>
    %79 = tpu.matmul %78, %66, %cst_26 {dimension_numbers = #tpu.dot_dimension_numbers<[1], [0], [0], [1], [0, 0, 1, 1], [], []>} : vector<16x16xbf16>, vector<16x32xbf16>, vector<16x32xf32> -> vector<16x32xf32>
    %80 = arith.truncf %79 : vector<16x32xf32> to vector<16x32xbf16>
    %c0_27 = arith.constant 0 : index
    %c96 = arith.constant 96 : index
    %81 = vector.load %arg12[%c0_27, %c96] : memref<16x128xbf16, #tpu.memory_space<vmem>>, vector<16x32xbf16>
    tpu.vector_store %arg12[%c0_27, %c96], %80 {strides = array<i32>} : memref<16x128xbf16, #tpu.memory_space<vmem>>, vector<16x32xbf16>,
    %c0_28 = arith.constant 0 : index
    %c0_29 = arith.constant 0 : index
    %82 = vector.load %arg12[%c0_28, %c0_29] : memref<16x128xbf16, #tpu.memory_space<vmem>>, vector<16x128xbf16>
    %c0_30 = arith.constant 0 : index
    %c0_31 = arith.constant 0 : index
    %83 = vector.load %arg5[%c0_30, %c0_31] : memref<128x128xbf16, #tpu.memory_space<vmem>>, vector<128x128xbf16>
    %cst_32 = arith.constant dense<0.000000e+00> : vector<16x128xf32>
    %84 = tpu.matmul %82, %83, %cst_32 {dimension_numbers = #tpu.dot_dimension_numbers<[1], [0], [0], [1], [0, 0, 1, 1], [], []>} : vector<16x128xbf16>, vector<128x128xbf16>, vector<16x128xf32> -> vector<16x128xf32>
    %c0_33 = arith.constant 0 : index
    %c0_34 = arith.constant 0 : index
    %85 = vector.load %arg6[%c0_33, %c0_34] : memref<1x128xf32, #tpu.memory_space<vmem>>, vector<1x128xf32>
    %86 = vector.broadcast %85 : vector<1x128xf32> to vector<16x128xf32>
    %87 = arith.addf %84, %86 : vector<16x128xf32>
    %88 = arith.addf %2, %87 : vector<16x128xf32>
    %89 = arith.truncf %88 : vector<16x128xf32> to vector<16x128xbf16>
    %c0_35 = arith.constant 0 : index
    %c0_36 = arith.constant 0 : index
    %90 = vector.load %arg7[%c0_35, %c0_36] : memref<128x256xbf16, #tpu.memory_space<vmem>>, vector<128x256xbf16>
    %cst_37 = arith.constant dense<0.000000e+00> : vector<16x256xf32>
    %91 = tpu.matmul %89, %90, %cst_37 {dimension_numbers = #tpu.dot_dimension_numbers<[1], [0], [0], [1], [0, 0, 1, 1], [], []>} : vector<16x128xbf16>, vector<128x256xbf16>, vector<16x256xf32> -> vector<16x256xf32>
    %c0_38 = arith.constant 0 : index
    %c0_39 = arith.constant 0 : index
    %92 = vector.load %arg8[%c0_38, %c0_39] : memref<1x256xf32, #tpu.memory_space<vmem>>, vector<1x256xf32>
    %93 = vector.broadcast %92 : vector<1x256xf32> to vector<16x256xf32>
    %94 = arith.addf %91, %93 : vector<16x256xf32>
    %cst_40 = arith.constant 0.000000e+00 : f32
    %95 = vector.broadcast %cst_40 : f32 to vector<16x256xf32>
    %96 = arith.maximumf %94, %95 : vector<16x256xf32>
    %97 = arith.truncf %96 : vector<16x256xf32> to vector<16x256xbf16>
    %c0_41 = arith.constant 0 : index
    %c0_42 = arith.constant 0 : index
    %98 = vector.load %arg9[%c0_41, %c0_42] : memref<256x128xbf16, #tpu.memory_space<vmem>>, vector<256x128xbf16>
    %cst_43 = arith.constant dense<0.000000e+00> : vector<16x128xf32>
    %99 = tpu.matmul %97, %98, %cst_43 {dimension_numbers = #tpu.dot_dimension_numbers<[1], [0], [0], [1], [0, 0, 1, 1], [], []>} : vector<16x256xbf16>, vector<256x128xbf16>, vector<16x128xf32> -> vector<16x128xf32>
    %c0_44 = arith.constant 0 : index
    %c0_45 = arith.constant 0 : index
    %100 = vector.load %arg10[%c0_44, %c0_45] : memref<1x128xf32, #tpu.memory_space<vmem>>, vector<1x128xf32>
    %101 = vector.broadcast %100 : vector<1x128xf32> to vector<16x128xf32>
    %102 = arith.addf %99, %101 : vector<16x128xf32>
    %103 = arith.addf %88, %102 : vector<16x128xf32>
    %c0_46 = arith.constant 0 : index
    %c0_47 = arith.constant 0 : index
    %104 = vector.load %arg11[%c0_46, %c0_47] : memref<16x128xf32, #tpu.memory_space<vmem>>, vector<16x128xf32>
    tpu.vector_store %arg11[%c0_46, %c0_47], %103 {strides = array<i32>} : memref<16x128xf32, #tpu.memory_space<vmem>>, vector<16x128xf32>,
    return
  }
  func.func @transform_0(%arg0: i32) -> (i32, i32) {
    %c0_i32 = arith.constant 0 : i32
    %c0_i32_0 = arith.constant 0 : i32
    return %c0_i32, %arg0 : i32, i32
  }
  func.func @transform_1(%arg0: i32) -> (i32, i32) {
    %c0_i32 = arith.constant 0 : i32
    %c0_i32_0 = arith.constant 0 : i32
    return %c0_i32, %arg0 : i32, i32
  }
  func.func @transform_2(%arg0: i32) -> (i32, i32) {
    %c0_i32 = arith.constant 0 : i32
    %c0_i32_0 = arith.constant 0 : i32
    %c0_i32_1 = arith.constant 0 : i32
    return %c0_i32, %c0_i32_0 : i32, i32
  }
  func.func @transform_3(%arg0: i32) -> (i32, i32) {
    %c0_i32 = arith.constant 0 : i32
    %c0_i32_0 = arith.constant 0 : i32
    %c0_i32_1 = arith.constant 0 : i32
    return %c0_i32, %c0_i32_0 : i32, i32
  }
  func.func @transform_4(%arg0: i32) -> (i32, i32) {
    %c0_i32 = arith.constant 0 : i32
    %c0_i32_0 = arith.constant 0 : i32
    %c0_i32_1 = arith.constant 0 : i32
    return %c0_i32, %c0_i32_0 : i32, i32
  }
  func.func @transform_5(%arg0: i32) -> (i32, i32) {
    %c0_i32 = arith.constant 0 : i32
    %c0_i32_0 = arith.constant 0 : i32
    %c0_i32_1 = arith.constant 0 : i32
    return %c0_i32, %c0_i32_0 : i32, i32
  }
  func.func @transform_6(%arg0: i32) -> (i32, i32) {
    %c0_i32 = arith.constant 0 : i32
    %c0_i32_0 = arith.constant 0 : i32
    %c0_i32_1 = arith.constant 0 : i32
    return %c0_i32, %c0_i32_0 : i32, i32
  }
  func.func @transform_7(%arg0: i32) -> (i32, i32) {
    %c0_i32 = arith.constant 0 : i32
    %c0_i32_0 = arith.constant 0 : i32
    %c0_i32_1 = arith.constant 0 : i32
    return %c0_i32, %c0_i32_0 : i32, i32
  }
  func.func @transform_8(%arg0: i32) -> (i32, i32) {
    %c0_i32 = arith.constant 0 : i32
    %c0_i32_0 = arith.constant 0 : i32
    %c0_i32_1 = arith.constant 0 : i32
    return %c0_i32, %c0_i32_0 : i32, i32
  }
  func.func @transform_9(%arg0: i32) -> (i32, i32) {
    %c0_i32 = arith.constant 0 : i32
    %c0_i32_0 = arith.constant 0 : i32
    %c0_i32_1 = arith.constant 0 : i32
    return %c0_i32, %c0_i32_0 : i32, i32
  }
  func.func @transform_10(%arg0: i32) -> (i32, i32) {
    %c0_i32 = arith.constant 0 : i32
    %c0_i32_0 = arith.constant 0 : i32
    return %c0_i32, %arg0 : i32, i32
  }
}

module attributes {stable_mosaic.version = 11 : i64} {
  func.func @encoder_layer_kernel(%arg0: i32, %arg1: memref<16x128xf32, #tpu.memory_space<vmem>>, %arg2: memref<16x128xf32, #tpu.memory_space<vmem>>, %arg3: memref<128x384xbf16, #tpu.memory_space<vmem>>, %arg4: memref<1x384xf32, #tpu.memory_space<vmem>>, %arg5: memref<128x128xbf16, #tpu.memory_space<vmem>>, %arg6: memref<1x128xf32, #tpu.memory_space<vmem>>, %arg7: memref<128x256xbf16, #tpu.memory_space<vmem>>, %arg8: memref<1x256xf32, #tpu.memory_space<vmem>>, %arg9: memref<256x128xbf16, #tpu.memory_space<vmem>>, %arg10: memref<1x128xf32, #tpu.memory_space<vmem>>, %arg11: memref<16x128xf32, #tpu.memory_space<vmem>>, %arg12: memref<16x128xbf16, #tpu.memory_space<vmem>>) attributes {dimension_semantics = [#tpu.dimension_semantics<parallel>], iteration_bounds = array<i64: 2>, scalar_prefetch = 0 : i64, scratch_operands = 1 : i64, tpu.core_type = #tpu.core_type<tc>, window_params = [{transform_indices = @transform_0, window_bounds = array<i64: 16, 128>}, {transform_indices = @transform_1, window_bounds = array<i64: 16, 128>}, {pipeline_mode = #tpu.pipeline_mode<synchronous>, transform_indices = @transform_2, window_bounds = array<i64: 128, 384>}, {pipeline_mode = #tpu.pipeline_mode<synchronous>, transform_indices = @transform_3, window_bounds = array<i64: 1, 384>}, {pipeline_mode = #tpu.pipeline_mode<synchronous>, transform_indices = @transform_4, window_bounds = array<i64: 128, 128>}, {pipeline_mode = #tpu.pipeline_mode<synchronous>, transform_indices = @transform_5, window_bounds = array<i64: 1, 128>}, {pipeline_mode = #tpu.pipeline_mode<synchronous>, transform_indices = @transform_6, window_bounds = array<i64: 128, 256>}, {pipeline_mode = #tpu.pipeline_mode<synchronous>, transform_indices = @transform_7, window_bounds = array<i64: 1, 256>}, {pipeline_mode = #tpu.pipeline_mode<synchronous>, transform_indices = @transform_8, window_bounds = array<i64: 256, 128>}, {pipeline_mode = #tpu.pipeline_mode<synchronous>, transform_indices = @transform_9, window_bounds = array<i64: 1, 128>}, {transform_indices = @transform_10, window_bounds = array<i64: 16, 128>}]} {
    %c0 = arith.constant 0 : index
    %c0_0 = arith.constant 0 : index
    %0 = vector.load %arg1[%c0, %c0_0] : memref<16x128xf32, #tpu.memory_space<vmem>>, vector<16x128xf32>
    %c0_1 = arith.constant 0 : index
    %c0_2 = arith.constant 0 : index
    %1 = vector.load %arg2[%c0_1, %c0_2] : memref<16x128xf32, #tpu.memory_space<vmem>>, vector<16x128xf32>
    %2 = arith.addf %0, %1 : vector<16x128xf32>
    %3 = arith.truncf %2 : vector<16x128xf32> to vector<16x128xbf16>
    %c0_3 = arith.constant 0 : index
    %c0_4 = arith.constant 0 : index
    %4 = vector.load %arg3[%c0_3, %c0_4] : memref<128x384xbf16, #tpu.memory_space<vmem>>, vector<128x384xbf16>
    %cst = arith.constant dense<0.000000e+00> : vector<16x384xf32>
    %5 = tpu.matmul %3, %4, %cst {dimension_numbers = #tpu.dot_dimension_numbers<[1], [0], [0], [1], [0, 0, 1, 1], [], []>} : vector<16x128xbf16>, vector<128x384xbf16>, vector<16x384xf32> -> vector<16x384xf32>
    %c0_5 = arith.constant 0 : index
    %c0_6 = arith.constant 0 : index
    %6 = vector.load %arg4[%c0_5, %c0_6] : memref<1x384xf32, #tpu.memory_space<vmem>>, vector<1x384xf32>
    %7 = vector.broadcast %6 : vector<1x384xf32> to vector<16x384xf32>
    %8 = arith.addf %5, %7 : vector<16x384xf32>
    %9 = arith.truncf %8 : vector<16x384xf32> to vector<16x384xbf16>
    %10 = vector.extract_strided_slice %9 {offsets = [0, 0], sizes = [16, 32], strides = [1, 1]} : vector<16x384xbf16> to vector<16x32xbf16>
    %11 = vector.extract_strided_slice %9 {offsets = [0, 128], sizes = [16, 32], strides = [1, 1]} : vector<16x384xbf16> to vector<16x32xbf16>
    %12 = vector.extract_strided_slice %9 {offsets = [0, 256], sizes = [16, 32], strides = [1, 1]} : vector<16x384xbf16> to vector<16x32xbf16>
    %cst_7 = arith.constant dense<0.000000e+00> : vector<16x16xf32>
    %13 = tpu.matmul %10, %11, %cst_7 {dimension_numbers = #tpu.dot_dimension_numbers<[1], [1], [0], [0], [0, 0, 1, 0], [], []>} : vector<16x32xbf16>, vector<16x32xbf16>, vector<16x16xf32> -> vector<16x16xf32>
    %cst_8 = arith.constant dense<0xFF800000> : vector<16xf32>
    %14 = vector.multi_reduction <maximumf>, %13, %cst_8 [1] : vector<16x16xf32> to vector<16xf32>
    %15 = vector.shape_cast %14 : vector<16xf32> to vector<16x1xf32>
    %16 = vector.broadcast %15 : vector<16x1xf32> to vector<16x16xf32>
    %17 = arith.subf %13, %16 : vector<16x16xf32>
    %18 = math.exp %17 : vector<16x16xf32>
    %cst_9 = arith.constant dense<0.000000e+00> : vector<16xf32>
    %19 = vector.multi_reduction <add>, %18, %cst_9 [1] : vector<16x16xf32> to vector<16xf32>
    %20 = vector.shape_cast %19 : vector<16xf32> to vector<16x1xf32>
    %21 = tpu.reciprocal %20 {approx = true} : vector<16x1xf32> -> vector<16x1xf32>
    %22 = vector.broadcast %21 : vector<16x1xf32> to vector<16x16xf32>
    %23 = arith.mulf %18, %22 : vector<16x16xf32>
    %24 = arith.truncf %23 : vector<16x16xf32> to vector<16x16xbf16>
    %cst_10 = arith.constant dense<0.000000e+00> : vector<16x32xf32>
    %25 = tpu.matmul %24, %12, %cst_10 {dimension_numbers = #tpu.dot_dimension_numbers<[1], [0], [0], [1], [0, 0, 1, 1], [], []>} : vector<16x16xbf16>, vector<16x32xbf16>, vector<16x32xf32> -> vector<16x32xf32>
    %26 = arith.truncf %25 : vector<16x32xf32> to vector<16x32xbf16>
    %c0_11 = arith.constant 0 : index
    %c0_12 = arith.constant 0 : index
    %27 = vector.load %arg12[%c0_11, %c0_12] : memref<16x128xbf16, #tpu.memory_space<vmem>>, vector<16x32xbf16>
    tpu.vector_store %arg12[%c0_11, %c0_12], %26 {strides = array<i32>} : memref<16x128xbf16, #tpu.memory_space<vmem>>, vector<16x32xbf16>,
    %28 = vector.extract_strided_slice %9 {offsets = [0, 32], sizes = [16, 32], strides = [1, 1]} : vector<16x384xbf16> to vector<16x32xbf16>
    %29 = vector.extract_strided_slice %9 {offsets = [0, 160], sizes = [16, 32], strides = [1, 1]} : vector<16x384xbf16> to vector<16x32xbf16>
    %30 = vector.extract_strided_slice %9 {offsets = [0, 288], sizes = [16, 32], strides = [1, 1]} : vector<16x384xbf16> to vector<16x32xbf16>
    %cst_13 = arith.constant dense<0.000000e+00> : vector<16x16xf32>
    %31 = tpu.matmul %28, %29, %cst_13 {dimension_numbers = #tpu.dot_dimension_numbers<[1], [1], [0], [0], [0, 0, 1, 0], [], []>} : vector<16x32xbf16>, vector<16x32xbf16>, vector<16x16xf32> -> vector<16x16xf32>
    %cst_14 = arith.constant dense<0xFF800000> : vector<16xf32>
    %32 = vector.multi_reduction <maximumf>, %31, %cst_14 [1] : vector<16x16xf32> to vector<16xf32>
    %33 = vector.shape_cast %32 : vector<16xf32> to vector<16x1xf32>
    %34 = vector.broadcast %33 : vector<16x1xf32> to vector<16x16xf32>
    %35 = arith.subf %31, %34 : vector<16x16xf32>
    %36 = math.exp %35 : vector<16x16xf32>
    %cst_15 = arith.constant dense<0.000000e+00> : vector<16xf32>
    %37 = vector.multi_reduction <add>, %36, %cst_15 [1] : vector<16x16xf32> to vector<16xf32>
    %38 = vector.shape_cast %37 : vector<16xf32> to vector<16x1xf32>
    %39 = tpu.reciprocal %38 {approx = true} : vector<16x1xf32> -> vector<16x1xf32>
    %40 = vector.broadcast %39 : vector<16x1xf32> to vector<16x16xf32>
    %41 = arith.mulf %36, %40 : vector<16x16xf32>
    %42 = arith.truncf %41 : vector<16x16xf32> to vector<16x16xbf16>
    %cst_16 = arith.constant dense<0.000000e+00> : vector<16x32xf32>
    %43 = tpu.matmul %42, %30, %cst_16 {dimension_numbers = #tpu.dot_dimension_numbers<[1], [0], [0], [1], [0, 0, 1, 1], [], []>} : vector<16x16xbf16>, vector<16x32xbf16>, vector<16x32xf32> -> vector<16x32xf32>
    %44 = arith.truncf %43 : vector<16x32xf32> to vector<16x32xbf16>
    %c0_17 = arith.constant 0 : index
    %c32 = arith.constant 32 : index
    %45 = vector.load %arg12[%c0_17, %c32] : memref<16x128xbf16, #tpu.memory_space<vmem>>, vector<16x32xbf16>
    tpu.vector_store %arg12[%c0_17, %c32], %44 {strides = array<i32>} : memref<16x128xbf16, #tpu.memory_space<vmem>>, vector<16x32xbf16>,
    %46 = vector.extract_strided_slice %9 {offsets = [0, 64], sizes = [16, 32], strides = [1, 1]} : vector<16x384xbf16> to vector<16x32xbf16>
    %47 = vector.extract_strided_slice %9 {offsets = [0, 192], sizes = [16, 32], strides = [1, 1]} : vector<16x384xbf16> to vector<16x32xbf16>
    %48 = vector.extract_strided_slice %9 {offsets = [0, 320], sizes = [16, 32], strides = [1, 1]} : vector<16x384xbf16> to vector<16x32xbf16>
    %cst_18 = arith.constant dense<0.000000e+00> : vector<16x16xf32>
    %49 = tpu.matmul %46, %47, %cst_18 {dimension_numbers = #tpu.dot_dimension_numbers<[1], [1], [0], [0], [0, 0, 1, 0], [], []>} : vector<16x32xbf16>, vector<16x32xbf16>, vector<16x16xf32> -> vector<16x16xf32>
    %cst_19 = arith.constant dense<0xFF800000> : vector<16xf32>
    %50 = vector.multi_reduction <maximumf>, %49, %cst_19 [1] : vector<16x16xf32> to vector<16xf32>
    %51 = vector.shape_cast %50 : vector<16xf32> to vector<16x1xf32>
    %52 = vector.broadcast %51 : vector<16x1xf32> to vector<16x16xf32>
    %53 = arith.subf %49, %52 : vector<16x16xf32>
    %54 = math.exp %53 : vector<16x16xf32>
    %cst_20 = arith.constant dense<0.000000e+00> : vector<16xf32>
    %55 = vector.multi_reduction <add>, %54, %cst_20 [1] : vector<16x16xf32> to vector<16xf32>
    %56 = vector.shape_cast %55 : vector<16xf32> to vector<16x1xf32>
    %57 = tpu.reciprocal %56 {approx = true} : vector<16x1xf32> -> vector<16x1xf32>
    %58 = vector.broadcast %57 : vector<16x1xf32> to vector<16x16xf32>
    %59 = arith.mulf %54, %58 : vector<16x16xf32>
    %60 = arith.truncf %59 : vector<16x16xf32> to vector<16x16xbf16>
    %cst_21 = arith.constant dense<0.000000e+00> : vector<16x32xf32>
    %61 = tpu.matmul %60, %48, %cst_21 {dimension_numbers = #tpu.dot_dimension_numbers<[1], [0], [0], [1], [0, 0, 1, 1], [], []>} : vector<16x16xbf16>, vector<16x32xbf16>, vector<16x32xf32> -> vector<16x32xf32>
    %62 = arith.truncf %61 : vector<16x32xf32> to vector<16x32xbf16>
    %c0_22 = arith.constant 0 : index
    %c64 = arith.constant 64 : index
    %63 = vector.load %arg12[%c0_22, %c64] : memref<16x128xbf16, #tpu.memory_space<vmem>>, vector<16x32xbf16>
    tpu.vector_store %arg12[%c0_22, %c64], %62 {strides = array<i32>} : memref<16x128xbf16, #tpu.memory_space<vmem>>, vector<16x32xbf16>,
    %64 = vector.extract_strided_slice %9 {offsets = [0, 96], sizes = [16, 32], strides = [1, 1]} : vector<16x384xbf16> to vector<16x32xbf16>
    %65 = vector.extract_strided_slice %9 {offsets = [0, 224], sizes = [16, 32], strides = [1, 1]} : vector<16x384xbf16> to vector<16x32xbf16>
    %66 = vector.extract_strided_slice %9 {offsets = [0, 352], sizes = [16, 32], strides = [1, 1]} : vector<16x384xbf16> to vector<16x32xbf16>
    %cst_23 = arith.constant dense<0.000000e+00> : vector<16x16xf32>
    %67 = tpu.matmul %64, %65, %cst_23 {dimension_numbers = #tpu.dot_dimension_numbers<[1], [1], [0], [0], [0, 0, 1, 0], [], []>} : vector<16x32xbf16>, vector<16x32xbf16>, vector<16x16xf32> -> vector<16x16xf32>
    %cst_24 = arith.constant dense<0xFF800000> : vector<16xf32>
    %68 = vector.multi_reduction <maximumf>, %67, %cst_24 [1] : vector<16x16xf32> to vector<16xf32>
    %69 = vector.shape_cast %68 : vector<16xf32> to vector<16x1xf32>
    %70 = vector.broadcast %69 : vector<16x1xf32> to vector<16x16xf32>
    %71 = arith.subf %67, %70 : vector<16x16xf32>
    %72 = math.exp %71 : vector<16x16xf32>
    %cst_25 = arith.constant dense<0.000000e+00> : vector<16xf32>
    %73 = vector.multi_reduction <add>, %72, %cst_25 [1] : vector<16x16xf32> to vector<16xf32>
    %74 = vector.shape_cast %73 : vector<16xf32> to vector<16x1xf32>
    %75 = tpu.reciprocal %74 {approx = true} : vector<16x1xf32> -> vector<16x1xf32>
    %76 = vector.broadcast %75 : vector<16x1xf32> to vector<16x16xf32>
    %77 = arith.mulf %72, %76 : vector<16x16xf32>
    %78 = arith.truncf %77 : vector<16x16xf32> to vector<16x16xbf16>
    %cst_26 = arith.constant dense<0.000000e+00> : vector<16x32xf32>
    %79 = tpu.matmul %78, %66, %cst_26 {dimension_numbers = #tpu.dot_dimension_numbers<[1], [0], [0], [1], [0, 0, 1, 1], [], []>} : vector<16x16xbf16>, vector<16x32xbf16>, vector<16x32xf32> -> vector<16x32xf32>
    %80 = arith.truncf %79 : vector<16x32xf32> to vector<16x32xbf16>
    %c0_27 = arith.constant 0 : index
    %c96 = arith.constant 96 : index
    %81 = vector.load %arg12[%c0_27, %c96] : memref<16x128xbf16, #tpu.memory_space<vmem>>, vector<16x32xbf16>
    tpu.vector_store %arg12[%c0_27, %c96], %80 {strides = array<i32>} : memref<16x128xbf16, #tpu.memory_space<vmem>>, vector<16x32xbf16>,
    %c0_28 = arith.constant 0 : index
    %c0_29 = arith.constant 0 : index
    %82 = vector.load %arg12[%c0_28, %c0_29] : memref<16x128xbf16, #tpu.memory_space<vmem>>, vector<16x128xbf16>
    %c0_30 = arith.constant 0 : index
    %c0_31 = arith.constant 0 : index
    %83 = vector.load %arg5[%c0_30, %c0_31] : memref<128x128xbf16, #tpu.memory_space<vmem>>, vector<128x128xbf16>
    %cst_32 = arith.constant dense<0.000000e+00> : vector<16x128xf32>
    %84 = tpu.matmul %82, %83, %cst_32 {dimension_numbers = #tpu.dot_dimension_numbers<[1], [0], [0], [1], [0, 0, 1, 1], [], []>} : vector<16x128xbf16>, vector<128x128xbf16>, vector<16x128xf32> -> vector<16x128xf32>
    %c0_33 = arith.constant 0 : index
    %c0_34 = arith.constant 0 : index
    %85 = vector.load %arg6[%c0_33, %c0_34] : memref<1x128xf32, #tpu.memory_space<vmem>>, vector<1x128xf32>
    %86 = vector.broadcast %85 : vector<1x128xf32> to vector<16x128xf32>
    %87 = arith.addf %84, %86 : vector<16x128xf32>
    %88 = arith.addf %2, %87 : vector<16x128xf32>
    %89 = arith.truncf %88 : vector<16x128xf32> to vector<16x128xbf16>
    %c0_35 = arith.constant 0 : index
    %c0_36 = arith.constant 0 : index
    %90 = vector.load %arg7[%c0_35, %c0_36] : memref<128x256xbf16, #tpu.memory_space<vmem>>, vector<128x256xbf16>
    %cst_37 = arith.constant dense<0.000000e+00> : vector<16x256xf32>
    %91 = tpu.matmul %89, %90, %cst_37 {dimension_numbers = #tpu.dot_dimension_numbers<[1], [0], [0], [1], [0, 0, 1, 1], [], []>} : vector<16x128xbf16>, vector<128x256xbf16>, vector<16x256xf32> -> vector<16x256xf32>
    %c0_38 = arith.constant 0 : index
    %c0_39 = arith.constant 0 : index
    %92 = vector.load %arg8[%c0_38, %c0_39] : memref<1x256xf32, #tpu.memory_space<vmem>>, vector<1x256xf32>
    %93 = vector.broadcast %92 : vector<1x256xf32> to vector<16x256xf32>
    %94 = arith.addf %91, %93 : vector<16x256xf32>
    %cst_40 = arith.constant 0.000000e+00 : f32
    %95 = vector.broadcast %cst_40 : f32 to vector<16x256xf32>
    %96 = arith.maximumf %94, %95 : vector<16x256xf32>
    %97 = arith.truncf %96 : vector<16x256xf32> to vector<16x256xbf16>
    %c0_41 = arith.constant 0 : index
    %c0_42 = arith.constant 0 : index
    %98 = vector.load %arg9[%c0_41, %c0_42] : memref<256x128xbf16, #tpu.memory_space<vmem>>, vector<256x128xbf16>
    %cst_43 = arith.constant dense<0.000000e+00> : vector<16x128xf32>
    %99 = tpu.matmul %97, %98, %cst_43 {dimension_numbers = #tpu.dot_dimension_numbers<[1], [0], [0], [1], [0, 0, 1, 1], [], []>} : vector<16x256xbf16>, vector<256x128xbf16>, vector<16x128xf32> -> vector<16x128xf32>
    %c0_44 = arith.constant 0 : index
    %c0_45 = arith.constant 0 : index
    %100 = vector.load %arg10[%c0_44, %c0_45] : memref<1x128xf32, #tpu.memory_space<vmem>>, vector<1x128xf32>
    %101 = vector.broadcast %100 : vector<1x128xf32> to vector<16x128xf32>
    %102 = arith.addf %99, %101 : vector<16x128xf32>
    %103 = arith.addf %88, %102 : vector<16x128xf32>
    %c0_46 = arith.constant 0 : index
    %c0_47 = arith.constant 0 : index
    %104 = vector.load %arg11[%c0_46, %c0_47] : memref<16x128xf32, #tpu.memory_space<vmem>>, vector<16x128xf32>
    tpu.vector_store %arg11[%c0_46, %c0_47], %103 {strides = array<i32>} : memref<16x128xf32, #tpu.memory_space<vmem>>, vector<16x128xf32>,
    return
  }
  func.func @transform_0(%arg0: i32) -> (i32, i32) {
    %c0_i32 = arith.constant 0 : i32
    %c0_i32_0 = arith.constant 0 : i32
    return %c0_i32, %arg0 : i32, i32
  }
  func.func @transform_1(%arg0: i32) -> (i32, i32) {
    %c0_i32 = arith.constant 0 : i32
    %c0_i32_0 = arith.constant 0 : i32
    return %c0_i32, %arg0 : i32, i32
  }
  func.func @transform_2(%arg0: i32) -> (i32, i32) {
    %c0_i32 = arith.constant 0 : i32
    %c0_i32_0 = arith.constant 0 : i32
    %c0_i32_1 = arith.constant 0 : i32
    return %c0_i32, %c0_i32_0 : i32, i32
  }
  func.func @transform_3(%arg0: i32) -> (i32, i32) {
    %c0_i32 = arith.constant 0 : i32
    %c0_i32_0 = arith.constant 0 : i32
    %c0_i32_1 = arith.constant 0 : i32
    return %c0_i32, %c0_i32_0 : i32, i32
  }
  func.func @transform_4(%arg0: i32) -> (i32, i32) {
    %c0_i32 = arith.constant 0 : i32
    %c0_i32_0 = arith.constant 0 : i32
    %c0_i32_1 = arith.constant 0 : i32
    return %c0_i32, %c0_i32_0 : i32, i32
  }
  func.func @transform_5(%arg0: i32) -> (i32, i32) {
    %c0_i32 = arith.constant 0 : i32
    %c0_i32_0 = arith.constant 0 : i32
    %c0_i32_1 = arith.constant 0 : i32
    return %c0_i32, %c0_i32_0 : i32, i32
  }
  func.func @transform_6(%arg0: i32) -> (i32, i32) {
    %c0_i32 = arith.constant 0 : i32
    %c0_i32_0 = arith.constant 0 : i32
    %c0_i32_1 = arith.constant 0 : i32
    return %c0_i32, %c0_i32_0 : i32, i32
  }
  func.func @transform_7(%arg0: i32) -> (i32, i32) {
    %c0_i32 = arith.constant 0 : i32
    %c0_i32_0 = arith.constant 0 : i32
    %c0_i32_1 = arith.constant 0 : i32
    return %c0_i32, %c0_i32_0 : i32, i32
  }
  func.func @transform_8(%arg0: i32) -> (i32, i32) {
    %c0_i32 = arith.constant 0 : i32
    %c0_i32_0 = arith.constant 0 : i32
    %c0_i32_1 = arith.constant 0 : i32
    return %c0_i32, %c0_i32_0 : i32, i32
  }
  func.func @transform_9(%arg0: i32) -> (i32, i32) {
    %c0_i32 = arith.constant 0 : i32
    %c0_i32_0 = arith.constant 0 : i32
    %c0_i32_1 = arith.constant 0 : i32
    return %c0_i32, %c0_i32_0 : i32, i32
  }
  func.func @transform_10(%arg0: i32) -> (i32, i32) {
    %c0_i32 = arith.constant 0 : i32
    %c0_i32_0 = arith.constant 0 : i32
    return %c0_i32, %arg0 : i32, i32
  }
}

</mosaic_0001>

<bundles_post_ra>
// kernel: tpu_custom_call.1
= control target key start
LH: loop header
LB: loop body
LE: loop exit
PB: predicated region body
PF: predicated region fallthrough
CT: control target
= control target key end

     0   :  { %s2765_s0 = inlined_call_operand.hbm [shape: f32[16,256], index: 0, kind: input, shape index: {}]   ;;  %s2766_s1 = inlined_call_operand.hbm [shape: f32[16,256], index: 1, kind: input, shape index: {}]   ;;  %s2767_s2 = inlined_call_operand.hbm [shape: bf16[128,384], index: 2, kind: input, shape index: {}]   ;;  %s2768_s3 = inlined_call_operand.hbm [shape: f32[1,384], index: 3, kind: input, shape index: {}]   ;;  %s2769_s4 = inlined_call_operand.hbm [shape: bf16[128,128], index: 4, kind: input, shape index: {}]   ;;  %s2770_s5 = inlined_call_operand.vmem [shape: f32[1,128], index: 5, kind: input, shape index: {}]   ;;  %s2771_s6 = inlined_call_operand.hbm [shape: bf16[128,256], index: 6, kind: input, shape index: {}]   ;;  %s2772_s7 = inlined_call_operand.vmem [shape: f32[1,256], index: 7, kind: input, shape index: {}]   ;;  %s2773_s8 = inlined_call_operand.hbm [shape: bf16[256,128], index: 8, kind: input, shape index: {}]   ;;  %s2774_s9 = inlined_call_operand.vmem [shape: f32[1,128], index: 9, kind: input, shape index: {}]   ;;  %s2775_s10 = inlined_call_operand.hbm [shape: f32[16,256], index: 10, kind: output, shape index: {}]  }
   0x1   :  { %2783 = sst [smem:[#allocation26_spill]] %s2765_s0 }
   0x2   :  { %2784 = sst [smem:[#allocation27_spill]] %s2767_s2 }
   0x3   :  { %2785 = sst [smem:[#allocation28_spill]] %s2768_s3 }
   0x4   :  { %2786 = sst [smem:[#allocation29_spill]] %s2769_s4 }
   0x5   :  { %2787 = sst [smem:[#allocation30_spill]] %s2771_s6 }
   0x6   :  { %2788 = sst [smem:[#allocation31_spill]] %s2773_s8 }
   0x7   :  { %15 = vsyncpa [#allocation4], 0 }
   0x8   :  { %17 = vsyncpa [#allocation4 + $0x1], 0 }
   0x9   :  { %18 = vsyncpa [#allocation7], 0 }
   0xa   :  { %20 = vsyncpa [#allocation7 + $0x1], 0 }
   0xb   :  { %21 = vsyncpa [#allocation10], 0 }
   0xc   :  { %22 = vsyncpa [#allocation13], 0 }
   0xd   :  { %23 = vsyncpa [#allocation5], 0 }
   0xe   :  { %25 = vsyncpa [#allocation5 + $0x1], 0  ;;  %s2468_s13 = smov 0   ;;  %s2470_s14 = smov 0  }
   0xf   :  { %s2472_s15 = smov 0   ;;  %s2474_s16 = smov 0  }
  0x10 LB: > { %2789 = sst [smem:[#allocation22_spill]] %s2381_s13  ;;  %s2489_s17 = sadd.s32 4294967295, %s2393_s16   ;;  %s2393_s16 = sphi %s2474_s16, %s2814_s16   ;;  %s2389_s15 = sphi %s2472_s15, %s2811_s15   ;;  %s2385_s14 = sphi %s2470_s14, %s2813_s14   ;;  %s2381_s13 = sphi %s2468_s13, %s2812_s13  }
  0x11   : > { %2790 = sst [smem:[#allocation23_spill]] %s2389_s15  ;;  %s1594_s18 = sadd.s32 4294967294, %s2393_s16  }
  0x12   : > { %p51_p0 = scmp.ne.s32.totalorder %s2385_s14, %s2381_s13  ;;  %p52_p1 = scmp.eq.s32.totalorder %s2489_s17, 0 }
  0x13   : > { %p269_p2 = scmp.eq.s32.totalorder %s2489_s17, 1  ;;  %p275_p3 = scmp.eq.s32.totalorder %s1594_s18, 1 }
  0x14   : > { %p2498_p4 = por %p52_p1, %p51_p0  ;;  %p1595_p5 = scmp.ge.s32.totalorder %s2393_s16, 1 }
  0x15   : > { %p2503_p6 = por %p275_p3, %p51_p0  ;;  %p282_p7 = scmp.lt.s32.totalorder %s2393_s16, 3 }
  0x16   : > { %s2794_s2 = sld [smem:[#allocation27_spill]]  ;;  %s2395_s25 = smov [#allocation8]  }
  0x17   : > { %s2792_s20 = scalar_select %p2503_p6, 1, 0 }
  0x18   : > { %p2511_p8 = pnand %p1595_p5, %p282_p7  ;;  %s295_s26 = sshll.u32 %s2395_s25, 4  ;;  %s296_s26 = int_to_ptr.vmem [resolvable:$true] %s295_s26 }
  0x19   : > { %2793 = sst [smem:[#allocation24_spill]] %s2792_s20  ;;  %s2396_s11 = smov 192  }
  0x1a   : > { %p1978_p9 = pneg %p2511_p8  ;;  %s2797_s3 = sld [smem:[#allocation28_spill]] }
  0x1b   : > { %s2397_s12 = smov 12   ;;  %s2398_s18 = smov [#allocation9]  }
  0x1c   : > { %s293_s23 = sshll.u32 %s2794_s2, 4  ;;  %p2519_p10 = pnand %p1978_p9, %p52_p1  ;;  %s294_s23 = int_to_ptr.hbm [resolvable:$true] %s293_s23 }
  0x1d   : > { %s310_s21 = sshll.u32 %s2398_s18, 4  ;;  %s2798_s6 = sld [smem:[#allocation30_spill]]  ;;  %s311_s21 = int_to_ptr.vmem [resolvable:$true] %s310_s21 }
  0x1e   : > { %1981 = dma.hbm_to_vmem [thread:$0]  (!%p2519_p10), %s294_s23, 3072, %s296_s26, [#allocation7], %s2396_s11, %s2396_s11, %s2397_s12  }
  0x1f   : > { %s2399_s20 = smov [#allocation12]   ;;  %s2799_s4 = sld [smem:[#allocation29_spill]] }
  0x20   : > { %s308_s30 = sshll.u32 %s2797_s3, 4  ;;  %s338_s28 = sshll.u32 %s2399_s20, 4  ;;  %s309_s30 = int_to_ptr.hbm [resolvable:$true] %s308_s30  ;;  %s339_s28 = int_to_ptr.vmem [resolvable:$true] %s338_s28 }
  0x21   : > { %1984 = dma.hbm_to_vmem [thread:$0]  (!%p2519_p10), %s309_s30, 48, %s311_s21, [#allocation10]  }
  0x22   : > { %s2778_s23 = smov 128   ;;  %s2780_s26 = smov 8  }
  0x23   : > { %s336_s2 = sshll.u32 %s2798_s6, 4  ;;  %s2402_s30 = smov [#allocation11]   ;;  %s337_s2 = int_to_ptr.hbm [resolvable:$true] %s336_s2 }
  0x24   : > { %1990 = dma.hbm_to_vmem [thread:$0]  (!%p2519_p10), %s337_s2, 2048, %s339_s28, [#allocation13], %s2778_s23, %s2778_s23, %s2780_s26  }
  0x25   : > { %s319_s13 = sshll.u32 %s2799_s4, 4  ;;  %s321_s20 = sshll.u32 %s2402_s30, 4  ;;  %s320_s13 = int_to_ptr.hbm [resolvable:$true] %s319_s13  ;;  %s322_s20 = int_to_ptr.vmem [resolvable:$true] %s321_s20 }
  0x26   : > { %s2403_s3 = smov 64   ;;  %s2404_s11 = smov 4  }
  0x27   : > { %1987 = dma.hbm_to_vmem [thread:$0]  (!%p2519_p10), %s320_s13, 1024, %s322_s20, [#allocation10], %s2403_s3, %s2403_s3, %s2404_s11  }
  0x28   : > { %s2800_s8 = sld [smem:[#allocation31_spill]]  ;;  %s2405_s2 = smov [#allocation14]  }
  0x29   : > { %s355_s22 = sshll.u32 %s2405_s2, 4  ;;  %s2550_s25 = sadd.s32 1, %s2393_s16   ;;  %s356_s22 = int_to_ptr.vmem [resolvable:$true] %s355_s22 }
  0x2a   : > { %s35_s28 = ssub.s32 %s2393_s16, %s2550_s25  ;;  %s38_s29 = sadd.s32 1, %s2389_s15 }
  0x2b   : > { %p36_p12 = scmp.eq.s32.totalorder %s35_s28, 0  ;;  %p45_p13 = scmp.ne.s32.totalorder %s2389_s15, %s2385_s14 }
  0x2c   : > { %p46_p0 = scmp.eq.s32.totalorder %s2393_s16, 0  ;;  %p2010_p3 = scmp.lt.s32.totalorder %s2393_s16, 2 }
  0x2d   : > { %s2560_s13 = scalar_select %p36_p12, %s2389_s15, %s38_s29  }
  0x2e   : > { %s353_s21 = sshll.u32 %s2800_s8, 4  ;;  %p47_p5 = por %p46_p0, %p45_p13  ;;  %s354_s21 = int_to_ptr.hbm [resolvable:$true] %s353_s21 }
  0x2f   : > { %1993 = dma.hbm_to_vmem [thread:$0]  (!%p2519_p10), %s354_s21, 2048, %s356_s22, [#allocation13], %s2403_s3, %s2403_s3, %s2404_s11  }
  0x30   : > { %2801 = sst [smem:[#allocation25_spill]] %s2560_s13  ;;  %p2564_p7 = por %p269_p2, %p45_p13 }
  0x31   : > { %s372_s27 = sand.u32 1, %s2389_s15   ;;  %s1603_s20 = sshll.u32 %s2393_s16, 3 }
  0x32   : > { %s2570_s3 = sshll.u32 %s372_s27, 4  ;;  %s2803_s0 = sld [smem:[#allocation26_spill]] }
  0x33   : > { %s376_s2 = scalar_lea.vmem [#allocation3], %s2570_s3  ;;  %p2578_p9 = pnand %p2010_p3, %p47_p5 }
  0x34   : > { %s383_s22 = sshll.u32 %s376_s2, 4  ;;  %s401_s26 = scalar_lea.hbm %s2766_s1, %s1603_s20  ;;  %s384_s22 = int_to_ptr.vmem [resolvable:$true] %s383_s22 }
  0x35   : > { %s402_s4 = sshll.u32 %s401_s26, 4  ;;  %s373_s11 = scalar_lea.sflag [#allocation4], %s372_s27  ;;  %s403_s4 = int_to_ptr.hbm [resolvable:$true] %s402_s4 }
  0x36   : > { %p2255_p10 = pneg %p2578_p9 }
  0x38   : > { %s380_s18 = scalar_lea.hbm %s2803_s0, %s1603_s20  ;;  %s2258_s8 = scalar_lea.hbm %s2803_s0, 32 }
  0x39   : > { %s381_s21 = sshll.u32 %s380_s18, 4  ;;  %s382_s21 = int_to_ptr.hbm [resolvable:$true] %s381_s21 }
  0x3a   : > { %s2251_s12 = sshra.s32 %s382_s21, 4  ;;  %s2252_s12 = int_to_ptr.hbm [resolvable:$true] %s2251_s12 }
  0x3b   : > { %s2253_s18 = scalar_lea.hbm %s2252_s12, 16  ;;  %p2259_p0 = scmp.lt.s32.totalorder %s2252_s12, %s2803_s0 }
  0x3c   : > { %p2254_p2 = scmp.ne.s32.totalorder %s2252_s12, %s2253_s18  ;;  %p2260_p3 = scmp.lt.s32.totalorder %s2258_s8, %s2253_s18 }
  0x3e   : > { %p2256_p12 = pnand %p2255_p10, %p2254_p2  ;;  %p2261_p5 = por %p2260_p3, %p2259_p0 }
  0x40   : > { %p2257_p13 = pneg %p2256_p12 }
  0x42   : > { %p2262_p11 = pnand %p2261_p5, %p2257_p13 }
  0x44   : > { %2265 = shalt.err (!%p2262_p11)
}
  0x45   : > { %s2406_s26 = smov 256   ;;  %s2805_s27 = smov 8  }
  0x46   : > { %s2806_s20 = smov 128   ;;  %s397_s6 = scalar_lea.vmem [#allocation6], %s2570_s3 }
  0x47   : > { %1997 = dma.hbm_to_vmem [thread:$0]  (!%p2578_p9), %s382_s21, 256, %s384_s22, %s373_s11, %s2406_s26, %s2806_s20, %s2805_s27  }
  0x48   : > { %s404_s2 = sshll.u32 %s397_s6, 4  ;;  %s393_s13 = sand.u32 1, %s2393_s16   ;;  %s405_s2 = int_to_ptr.vmem [resolvable:$true] %s404_s2 }
  0x49   : > { %s394_s23 = scalar_lea.sflag [#allocation7], %s393_s13  ;;  %s2281_s12 = sshra.s32 %s403_s4, 4  ;;  %s2282_s12 = int_to_ptr.hbm [resolvable:$true] %s2281_s12 }
  0x4a   : > { %s2283_s8 = scalar_lea.hbm %s2282_s12, 16  ;;  %s2288_s0 = scalar_lea.hbm %s2766_s1, 32 }
  0x4b   : > { %p2284_p2 = scmp.ne.s32.totalorder %s2282_s12, %s2283_s8  ;;  %p2289_p13 = scmp.lt.s32.totalorder %s2282_s12, %s2766_s1 }
  0x4c   : > { %p2290_p0 = scmp.lt.s32.totalorder %s2288_s0, %s2283_s8 }
  0x4d   : > { %p2286_p11 = pnand %p2284_p2, %p2255_p10 }
  0x4e   : > { %p2291_p3 = por %p2290_p0, %p2289_p13 }
  0x4f   : > { %p2287_p12 = pneg %p2286_p11 }
  0x51   : > { %p2292_p5 = pnand %p2291_p3, %p2287_p12 }
  0x53   : > { %2295 = shalt.err (!%p2292_p5)
}
  0x54   : > { %2000 = dma.hbm_to_vmem [thread:$0]  (!%p2578_p9), %s403_s4, 256, %s405_s2, %s394_s23, %s2406_s26, %s2806_s20, %s2805_s27  }
  0x55   : > { %416 = sbr.rel (%p2511_p8) target bundleno = 1814 (0x716), region = 60  ;;  %s2618_s13 = sand.u32 (!%p2511_p8), 1, %s2385_s14  }
  0x56   : > { %s2621_s15 = sshll.u32 (!%p2511_p8), %s2618_s13, 4  ;;  %s419_s0 = scalar_lea.sflag (!%p2511_p8), [#allocation4], %s2618_s13 }
  0x57   : > { %s422_s3 = scalar_lea.vmem (!%p2511_p8), [#allocation3], %s2621_s15 }
  0x5a   : > { %2356 = dma.done.wait (%p2498_p4), %s419_s0, 256  }
  0x5b   : > { %2358 = vsyncadd (%p2498_p4), %s419_s0, 4294967040  ;;  %s428_s4 = sand.u32 1, %s2489_s17   ;;  %s432_s22 = scalar_lea.vmem [#allocation6], %s2621_s15 }
  0x5c   : > { %s429_s24 = scalar_lea.sflag [#allocation7], %s428_s4 }
  0x5d   : > { %2360 = dma.done.wait (%p2498_p4), %s429_s24, 256  }
  0x5e   : > { %2362 = vsyncadd (%p2498_p4), %s429_s24, 4294967040 }
  0x5f   : > { %2364 = dma.done.wait (%p52_p1), [#allocation7], 3072  }
  0x60   : > { %2366 = vsyncadd (%p52_p1), [#allocation7], 4294964224 }
  0x61   : > { %2368 = dma.done.wait (%p52_p1), [#allocation10], 1072  }
  0x62   : > { %2370 = vsyncadd (%p52_p1), [#allocation10], 4294966224 }
  0x63   : > { %2372 = dma.done.wait (%p52_p1), [#allocation13], 4096  }
  0x64   : > { %2374 = vsyncadd (%p52_p1), [#allocation13], 4294963200  ;;  %v1701_v0 = vld [vmem:[#allocation8 + $0xa8] sm:$0xf]  ;;  %v1909_v1 = vld [vmem:[#allocation8 + $0xb0] sm:$0xf0] }
  0x65   : > { %v1908_v2 = vld [vmem:[#allocation8 + $0xac] sm:$0xf]  ;;  %v1702_v3 = vor.u32 %v1909_v1, %v1701_v0  ;;  %v1703_v4 = vld [vmem:[#allocation8 + $0xb4] sm:$0xf0]  ;;  %v1689_v5 = vld [vmem:[#allocation8 + $0x90] sm:$0xf] }
  0x66   : > { %v1906_v6 = vld [vmem:[#allocation8 + $0x98] sm:$0xf0]  ;;  %v1706_v7 = vor.u32 %v1908_v2, %v1703_v4  ;;  %v1905_v8 = vld [vmem:[#allocation8 + $0x94] sm:$0xf]  ;;  %v1691_v9 = vld [vmem:[#allocation8 + $0x9c] sm:$0xf0] }
  0x67   : > { %676 = vmatpush.bf16.msra.mxu0 %v1702_v3  ;;  %v1690_v10 = vor.u32 %v1906_v6, %v1689_v5  ;;  %v1694_v11 = vor.u32 %v1905_v8, %v1691_v9  ;;  %v1677_v12 = vld [vmem:[#allocation8 + $0x78] sm:$0xf]  ;;  %v1903_v13 = vld [vmem:[#allocation8 + $0x80] sm:$0xf0]  ;;  %v1902_v14 = vld [vmem:[#allocation8 + $0x7c] sm:$0xf] }
  0x68   : > { %690 = vmatpush.bf16.msra.mxu1 %v1706_v7  ;;  %v1679_v15 = vld [vmem:[#allocation8 + $0x84] sm:$0xf0]  ;;  %v1678_v16 = vor.u32 %v1903_v13, %v1677_v12  ;;  %v1665_v18 = vld [vmem:[#allocation8 + $0x60] sm:$0xf]  ;;  %v1900_v19 = vld [vmem:[#allocation8 + $0x68] sm:$0xf0] }
  0x69   : > { %v1682_v17 = vor.u32 %v1902_v14, %v1679_v15  ;;  %v1899_v20 = vld [vmem:[#allocation8 + $0x64] sm:$0xf]  ;;  %v1667_v21 = vld [vmem:[#allocation8 + $0x6c] sm:$0xf0]  ;;  %v1666_v22 = vor.u32 %v1900_v19, %v1665_v18  ;;  %v1653_v23 = vld [vmem:[#allocation8 + $0x48] sm:$0xf] }
  0x6a   : > { %v1897_v24 = vld [vmem:[#allocation8 + $0x50] sm:$0xf0]  ;;  %v1670_v25 = vor.u32 %v1899_v20, %v1667_v21  ;;  %v1709_v26 = vld [vmem:[#allocation8 + $0xb0] sm:$0xf]  ;;  %v1910_v27 = vld [vmem:[#allocation8 + $0xb8] sm:$0xf0] }
  0x6b   : > { %677 = vmatpush.bf16.msra.mxu0 %v1690_v10  ;;  %v1697_v28 = vld [vmem:[#allocation8 + $0x98] sm:$0xf]  ;;  %v1896_v29 = vld [vmem:[#allocation8 + $0x4c] sm:$0xf]  ;;  %v1710_v31 = vor.u32 %v1910_v27, %v1709_v26  ;;  %v1907_v32 = vld [vmem:[#allocation8 + $0xa0] sm:$0xf0]  ;;  %v1654_v33 = vor.u32 %v1897_v24, %v1653_v23 }
  0x6c   : > { %691 = vmatpush.bf16.msra.mxu1 %v1694_v11  ;;  %v1655_v30 = vld [vmem:[#allocation8 + $0x54] sm:$0xf0]  ;;  %v1641_v34 = vld [vmem:[#allocation8 + $0x30] sm:$0xf]  ;;  %v1698_v35 = vor.u32 %v1907_v32, %v1697_v28  ;;  %v1894_v37 = vld [vmem:[#allocation8 + $0x38] sm:$0xf0] }
  0x6d   : > { %704 = vmatpush.bf16.msra.mxu2 %v1710_v31  ;;  %v1658_v36 = vor.u32 %v1896_v29, %v1655_v30  ;;  %v1685_v38 = vld [vmem:[#allocation8 + $0x80] sm:$0xf]  ;;  %v1904_v39 = vld [vmem:[#allocation8 + $0x88] sm:$0xf0]  ;;  %v1893_v40 = vld [vmem:[#allocation8 + $0x34] sm:$0xf]  ;;  %v1642_v42 = vor.u32 %v1894_v37, %v1641_v34 }
  0x6e   : > { %v1643_v41 = vld [vmem:[#allocation8 + $0x3c] sm:$0xf0]  ;;  %v1629_v43 = vld [vmem:[#allocation8 + $0x18] sm:$0xf]  ;;  %v1686_v44 = vor.u32 %v1904_v39, %v1685_v38  ;;  %v1891_v46 = vld [vmem:[#allocation8 + $0x20] sm:$0xf0] }
  0x6f   : > { %678 = vmatpush.bf16.msra.mxu0 %v1678_v16  ;;  %v1646_v45 = vor.u32 %v1893_v40, %v1643_v41  ;;  %v1673_v47 = vld [vmem:[#allocation8 + $0x68] sm:$0xf]  ;;  %v1901_v48 = vld [vmem:[#allocation8 + $0x70] sm:$0xf0]  ;;  %v1890_v49 = vld [vmem:[#allocation8 + $0x1c] sm:$0xf]  ;;  %v1630_v53 = vor.u32 %v1891_v46, %v1629_v43 }
  0x70   : > { %692 = vmatpush.bf16.msra.mxu1 %v1682_v17  ;;  %v1631_v50 = vld [vmem:[#allocation8 + $0x24] sm:$0xf0]  ;;  %v1617_v51 = vld [vmem:[#allocation8] sm:$0xf]  ;;  %v1674_v57 = vor.u32 %v1901_v48, %v1673_v47  ;;  %v1888_v59 = vld [vmem:[#allocation8 + $0x8] sm:$0xf0] }
  0x71   : > { %705 = vmatpush.bf16.msra.mxu2 %v1698_v35  ;;  %v501_v52 = vld [vmem:[%s422_s3] sm:$0xff]  ;;  %v502_v54 = vld [vmem:[%s422_s3 + $0x8] sm:$0xff]  ;;  %v1634_v58 = vor.u32 %v1890_v49, %v1631_v50  ;;  %v1618_v2 = vor.u32 %v1888_v59, %v1617_v51  ;;  %vm730_vm0 = vcmask 261120   ;;  %s2407_s19 = smov 96   ;;  %s2408_s28 = smov 64   ;;  %vm751_vm1 = vcmask 130048  }
  0x72   : > { %v503_v55 = vld [vmem:[%s432_s22] sm:$0xff]  ;;  %v504_v56 = vld [vmem:[%s432_s22 + $0x8] sm:$0xff]  ;;  %s2409_s11 = smov 32   ;;  %vm800_vm2 = vcmask 257024   ;;  %vm880_vm3 = vcmask 519424   ;;  %vm960_vm4 = vcmask 781824  }
  0x73   : > { %679 = vmatpush.bf16.msra.mxu0 %v1666_v22  ;;  %v1661_v60 = vld [vmem:[#allocation8 + $0x50] sm:$0xf]  ;;  %v1898_v61 = vld [vmem:[#allocation8 + $0x58] sm:$0xf0]  ;;  %v1887_v62 = vld [vmem:[#allocation8 + $0x4] sm:$0xf]  ;;  %v2655_v0 = vadd.f32 %v503_v55, %v501_v52  ;;  %v2657_v1 = vadd.f32 %v504_v56, %v502_v54 }
  0x74   : > { %693 = vmatpush.bf16.msra.mxu1 %v1670_v25  ;;  %v1619_v63 = vld [vmem:[#allocation8 + $0xc] sm:$0xf0]  ;;  %v1662_v3 = vor.u32 %v1898_v61, %v1661_v60  ;;  %v1649_v5 = vld [vmem:[#allocation8 + $0x38] sm:$0xf]  ;;  %v1895_v6 = vld [vmem:[#allocation8 + $0x40] sm:$0xf0] }
  0x75   : > { %706 = vmatpush.bf16.msra.mxu2 %v1686_v44  ;;  %v1622_v4 = vor.u32 %v1887_v62, %v1619_v63  ;;  %v507_v7 = vpack.c.bf16 %v2657_v1, %v2655_v0  ;;  %v1650_v8 = vor.u32 %v1895_v6, %v1649_v5  ;;  %v1637_v9 = vld [vmem:[#allocation8 + $0x20] sm:$0xf]  ;;  %v1892_v10 = vld [vmem:[#allocation8 + $0x28] sm:$0xf0]  ;;  %v1625_v12 = vld [vmem:[#allocation8 + $0x8] sm:$0xf] }
  0x76   : > { %v1638_v11 = vor.u32 %v1892_v10, %v1637_v9  ;;  %v1889_v13 = vld [vmem:[#allocation8 + $0x10] sm:$0xf0]  ;;  %v540_v15 = vld [vmem:[#allocation9] sm:$0x7]  ;;  %vm1040_vm5 = vcmask 1044224   ;;  %s1884_s12 = sshll.u32 %s2489_s17, 3 }
  0x77   : > { %680 = vmatpush.bf16.msra.mxu0 %v1654_v33  ;;  %v1626_v14 = vor.u32 %v1889_v13, %v1625_v12  ;;  %v542_v18 = vperm.slane %v540_v15, 0  ;;  %v543_v19 = vperm.slane %v540_v15, 1  ;;  %v544_v31 = vperm.slane %v540_v15, 2  ;;  %s1447_s29 = scalar_lea.hbm %s2775_s10, %s1884_s12  ;;  %s499_s21 = scalar_lea.vmem [#allocation15], %s2621_s15 }
  0x78   : > { %694 = vmatpush.bf16.msra.mxu1 %v1658_v36  ;;  %s1448_s0 = sshll.u32 %s499_s21, 4  ;;  %s1450_s3 = sshll.u32 %s1447_s29, 4  ;;  %s1449_s0 = int_to_ptr.vmem [resolvable:$true] %s1448_s0  ;;  %s1451_s3 = int_to_ptr.hbm [resolvable:$true] %s1450_s3 }
  0x79   : > { %707 = vmatpush.bf16.msra.mxu2 %v1674_v57  ;;  %s1437_s4 = scalar_lea.sflag [#allocation5], %s2618_s13  ;;  %s2325_s17 = sshra.s32 %s1451_s3, 4  ;;  %s2326_s17 = int_to_ptr.hbm [resolvable:$true] %s2325_s17 }
  0x7a   : > { %s2327_s24 = scalar_lea.hbm %s2326_s17, 16  ;;  %p2332_p9 = scmp.lt.s32.totalorder %s2326_s17, %s2775_s10 }
  0x7b   : > { %681 = vmatpush.bf16.msra.mxu0 %v1642_v42  ;;  %p2328_p1 = scmp.ne.s32.totalorder %s2326_s17, %s2327_s24 }
  0x7c   : > { %695 = vmatpush.bf16.msra.mxu1 %v1646_v45 }
  0x7d   : > { %708 = vmatpush.bf16.msra.mxu2 %v1662_v3  ;;  %p2329_p4 = pnand %p2328_p1, %p2564_p7 }
  0x7f   : > { %682 = vmatpush.bf16.msra.mxu0 %v1630_v53  ;;  %p2330_p8 = pneg %p2329_p4 }
  0x80   : > { %696 = vmatpush.bf16.msra.mxu1 %v1634_v58 }
  0x81   : > { %709 = vmatpush.bf16.msra.mxu2 %v1650_v8 }
  0x83   : > { %683 = vmatpush.bf16.msra.mxu0 %v1618_v2 }
  0x84   : > { %697 = vmatpush.bf16.msra.mxu1 %v1622_v4 }
  0x85   : > { %710 = vmatpush.bf16.msra.mxu2 %v1638_v11 }
  0x86   : > { %684 = vmatmul.bf16.vlgmr.msra.gmra.mxu0 %v507_v7 }
  0x87   : > { %698 = vmatmul.bf16.vlgmr.msra.gmra.mxu1 %v507_v7 }
  0x89   : > { %711 = vmatpush.bf16.msra.mxu2 %v1626_v14 }
  0x8c   : > { %712 = vmatmul.bf16.vlgmr.msra.gmra.mxu2 %v507_v7 }
 0x103   : > { %v685_v16 = vpop.f32.mrf.mxu0 }
 0x104   : > { %v699_v17 = vpop.f32.mrf.mxu1  ;;  %v686_v20 = vadd.f32 %v685_v16, %v542_v18 }
 0x105   : > { %v700_v21 = vadd.f32 %v699_v17, %v543_v19 }
 0x107   : > { %v718_v25 = vpack.c.bf16 %v700_v21, %v686_v20 }
 0x109   : > { %v727_v28 = vunpack.c.h.b16 %v718_v25  ;;  %v724_v36 = vunpack.c.l.b16 %v718_v25 }
 0x10b   : > { %v687_v22 = vpop.f32.mrf.mxu0 }
 0x10c   : > { %v688_v23 = vadd.f32 %v687_v22, %v542_v18  ;;  %v701_v24 = vpop.f32.mrf.mxu1 }
 0x10d   : > { %v702_v26 = vadd.f32 %v701_v24, %v543_v19 }
 0x10f   : > { %v720_v27 = vpack.c.bf16 %v702_v26, %v688_v23  ;;  %v713_v33 = vpop.f32.mrf.mxu2 }
 0x110   : > { %v714_v35 = vadd.f32 %v713_v33, %v544_v31 }
 0x111   : > { %v728_v29 = vunpack.c.h.b16 %v720_v27  ;;  %v725_v34 = vunpack.c.l.b16 %v720_v27 }
 0x112   : > { %v719_v38 = vpack.c.bf16 %v714_v35, %v714_v35 }
 0x113   : > { %v729_v30 = vpack.c.b16 %v728_v29, %v727_v28  ;;  %v726_v37 = vpack.c.b16 %v725_v34, %v724_v36 }
 0x114   : > { %v777_v41 = vunpack.c.l.b16 %v719_v38 }
 0x115   : > { %805 = vrot.lane.b32.xlu2 %v729_v30, %s2407_s19  ;;  %v735_v32 = vsel %vm730_vm0, %v729_v30, 0 }
 0x116   : > { %744 = vmatpush.bf16.xpose.msra.mxu3 %v735_v32 }
 0x117   : > { %v715_v39 = vpop.f32.mrf.mxu2 }
 0x118   : > { %v716_v40 = vadd.f32 %v715_v39, %v544_v31 }
 0x11a   : > { %v721_v42 = vpack.c.bf16 %v716_v40, %v716_v40 }
 0x11c   : > { %v778_v43 = vunpack.c.l.b16 %v721_v42 }
 0x11d   : > { %803 = vrot.lane.b32.xlu2 %v726_v37, %s2407_s19  ;;  %1711 = vmatmul.msk.bf16.vlgmr.msra.gmra.mxu3 %vm730_vm0, %v726_v37 }
 0x11e   : > { %v2665_v44 = vpack.c.b16 %v778_v43, %v777_v41 }
 0x120   : > { %791 = vmatpush.bf16.msrb.mxu3 %v2665_v44 }
 0x125   : > { %883 = vrot.lane.b32.xlu2 %v726_v37, %s2408_s28 }
 0x12d   : > { %963 = vrot.lane.b32.xlu2 %v726_v37, %s2409_s11 }
 0x16f   : > { %v806_v45 = vpop.permute.xlu2 %805 }
 0x170   : > { %v811_v46 = vsel %vm730_vm0, %v806_v45, 0 }
 0x171   : > { %820 = vmatpush.bf16.xpose.msra.mxu3 %v811_v46 }
 0x177   : > { %v804_v61 = vpop.permute.xlu2 %803 }
 0x17f   : > { %v884_v2 = vpop.permute.xlu2 %883 }
 0x187   : > { %v964_v14 = vpop.permute.xlu2 %963 }
 0x1a0   : > { %v746_v47 = vpop.f32.mrf.mxu3 }
 0x1a1   : > { %v752_v48 = vsel %vm751_vm1, %v746_v47, -inf }
 0x1a2   : > { %753 = vmax.xlane.f32.xlu0 %v752_v48 }
 0x1a8   : > { %v748_v49 = vpop.f32.mrf.mxu3 }
 0x1a9   : > { %v755_v50 = vsel %vm751_vm1, %v748_v49, -inf }
 0x1aa   : > { %756 = vmax.xlane.f32.xlu0 %v755_v50 }
 0x1be   : > { %885 = vrot.lane.b32.xlu0 %v729_v30, %s2408_s28 }
 0x215   : > { %v754_v51 = vpop.xlane.xlu0 %753 }
 0x216   : > { %v758_v52 = vsub.f32 %v746_v47, %v754_v51 }
 0x218   : > { %v760_v53 = vmul.f32 1.442695, %v758_v52 }
 0x21a   : > { %2069 = vpow2.f32 %v760_v53 }
 0x21d   : > { %v757_v54 = vpop.xlane.xlu0 %756 }
 0x21e   : > { %v759_v55 = vsub.f32 %v748_v49, %v757_v54 }
 0x220   : > { %v2070_v56 = vpop.eup %2069  ;;  %v762_v57 = vmul.f32 1.442695, %v759_v55 }
 0x221   : > { %v764_v58 = vsel %vm751_vm1, %v2070_v56, 0.0 }
 0x222   : > { %2071 = vpow2.f32 %v762_v57  ;;  %765 = vadd.xlane.f32.xlu1 %v764_v58 }
 0x228   : > { %v2072_v59 = vpop.eup %2071 }
 0x229   : > { %v767_v60 = vsel %vm751_vm1, %v2072_v59, 0.0 }
 0x22a   : > { %768 = vadd.xlane.f32.xlu1 %v767_v60 }
 0x230   : > { %v886_v62 = vpop.permute.xlu0 %885 }
 0x231   : > { %v891_v63 = vsel %vm730_vm0, %v886_v62, 0 }
 0x232   : > { %900 = vmatpush.bf16.xpose.msrb.mxu2 %v891_v63 }
 0x239   : > { %1715 = vmatmul.msk.bf16.vlgmr.msrb.gmra.mxu2 %vm730_vm0, %v884_v2 }
 0x243   : > { %965 = vrot.lane.b32.xlu1 %v729_v30, %s2409_s11 }
 0x295   : > { %v766_v3 = vpop.xlane.xlu1 %765 }
 0x296   : > { %2073 = vrcp.f32 %v766_v3 }
 0x29c   : > { %v2074_v5 = vpop.eup %2073 }
 0x29d   : > { %v769_v4 = vpop.xlane.xlu1 %768  ;;  %v772_v7 = vmul.f32 %v2074_v5, %v2070_v56 }
 0x29e   : > { %2075 = vrcp.f32 %v769_v4 }
 0x2a4   : > { %v2076_v6 = vpop.eup %2075 }
 0x2a5   : > { %v773_v8 = vmul.f32 %v2076_v6, %v2072_v59 }
 0x2a7   : > { %v774_v9 = vpack.c.bf16 %v773_v8, %v772_v7 }
 0x2a9   : > { %1712 = vmatmul.msk.bf16.vlgmr.msrb.gmra.mxu3 %vm751_vm1, %v774_v9 }
 0x2b5   : > { %v966_v10 = vpop.permute.xlu1 %965 }
 0x2b6   : > { %v971_v11 = vsel %vm730_vm0, %v966_v10, 0 }
 0x2b7   : > { %980 = vmatpush.bf16.xpose.msrb.mxu3 %v971_v11 }
 0x2b9   : > { %1713 = vmatmul.msk.bf16.vlgmr.msra.gmra.mxu3 %vm730_vm0, %v804_v61 }
 0x2bc   : > { %v902_v12 = vpop.f32.mrf.mxu2 }
 0x2bd   : > { %v907_v13 = vsel %vm751_vm1, %v902_v12, -inf }
 0x2be   : > { %908 = vmax.xlane.f32.xlu1 %v907_v13 }
 0x2c4   : > { %v904_v26 = vpop.f32.mrf.mxu2 }
 0x2c5   : > { %v910_v29 = vsel %vm751_vm1, %v904_v26, -inf }
 0x2c9   : > { %1717 = vmatmul.msk.bf16.vlgmr.msrb.gmra.mxu3 %vm730_vm0, %v964_v14 }
 0x32c   : > { %v793_v15 = vpop.f32.mrf.mxu3 }
 0x32d   : > { %v798_v16 = vpack.c.bf16 %v793_v15, %v793_v15 }
 0x32f   : > { %801 = vst.msk [vmem:[#allocation2] sm:$0xf] %vm800_vm2, %v798_v16 }
 0x331   : > { %v909_v17 = vpop.xlane.xlu1 %908 }
 0x332   : > { %v913_v18 = vsub.f32 %v902_v12, %v909_v17 }
 0x334   : > { %v915_v19 = vmul.f32 1.442695, %v913_v18  ;;  %v795_v20 = vpop.f32.mrf.mxu3 }
 0x335   : > { %v799_v21 = vpack.c.bf16 %v795_v20, %v795_v20 }
 0x336   : > { %2077 = vpow2.f32 %v915_v19 }
 0x337   : > { %802 = vst.msk [vmem:[#allocation2 + $0x4] sm:$0xf] %vm800_vm2, %v799_v21 }
 0x33c   : > { %v2684_v22 = vpop.eup %2077  ;;  %v822_v23 = vpop.f32.mrf.mxu3 }
 0x33d   : > { %v827_v24 = vsel %vm751_vm1, %v822_v23, -inf  ;;  %v919_v25 = vsel %vm751_vm1, %v2684_v22, 0.0 }
 0x33e   : > { %828 = vmax.xlane.f32.xlu2 %v827_v24  ;;  %920 = vadd.xlane.f32.xlu1 %v919_v25 }
 0x344   : > { %v824_v27 = vpop.f32.mrf.mxu3 }
 0x345   : > { %v830_v28 = vsel %vm751_vm1, %v824_v27, -inf }
 0x346   : > { %831 = vmax.xlane.f32.xlu0 %v830_v28  ;;  %911 = vmax.xlane.f32.xlu2 %v910_v29 }
 0x34c   : > { %v982_v30 = vpop.f32.mrf.mxu3 }
 0x34d   : > { %v987_v31 = vsel %vm751_vm1, %v982_v30, -inf }
 0x34e   : > { %988 = vmax.xlane.f32.xlu0 %v987_v31 }
 0x354   : > { %v984_v32 = vpop.f32.mrf.mxu3 }
 0x355   : > { %v990_v33 = vsel %vm751_vm1, %v984_v32, -inf }
 0x356   : > { %991 = vmax.xlane.f32.xlu2 %v990_v33  ;;  %v1919_v33 = vld [vmem:[#allocation11 + $0x38] sm:$0xff] }
 0x357   : > { %1119 = vmatpush.bf16.msrb.mxu1 %v1919_v33 }
 0x36e   : > { %850 = vrot.lane.b32.xlu2 %v2665_v44, %s2407_s19 }
 0x3b1   : > { %v829_v34 = vpop.xlane.xlu2 %828  ;;  %v921_v61 = vpop.xlane.xlu1 %920 }
 0x3b2   : > { %v833_v35 = vsub.f32 %v822_v23, %v829_v34  ;;  %v1918_v34 = vld [vmem:[#allocation11 + $0x30] sm:$0xff] }
 0x3b3   : > { %1120 = vmatpush.bf16.msrb.mxu1 %v1918_v34  ;;  %v1943_v34 = vld [vmem:[#allocation14 + $0x38] sm:$0xff] }
 0x3b4   : > { %v835_v36 = vmul.f32 1.442695, %v833_v35  ;;  %v1917_v35 = vld [vmem:[#allocation11 + $0x28] sm:$0xff] }
 0x3b6   : > { %2079 = vpow2.f32 %v835_v36  ;;  %v1916_v36 = vld [vmem:[#allocation11 + $0x20] sm:$0xff] }
 0x3b7   : > { %1121 = vmatpush.bf16.msrb.mxu1 %v1917_v35  ;;  %v1951_v35 = vld [vmem:[#allocation14 + $0x78] sm:$0xff] }
 0x3b9   : > { %v912_v37 = vpop.xlane.xlu2 %911  ;;  %v832_v38 = vpop.xlane.xlu0 %831 }
 0x3ba   : > { %v914_v39 = vsub.f32 %v904_v26, %v912_v37  ;;  %v834_v42 = vsub.f32 %v824_v27, %v832_v38  ;;  %v1915_v37 = vld [vmem:[#allocation11 + $0x18] sm:$0xff]  ;;  %v1914_v38 = vld [vmem:[#allocation11 + $0x10] sm:$0xff] }
 0x3bb   : > { %1122 = vmatpush.bf16.msrb.mxu1 %v1916_v36  ;;  %v1942_v36 = vld [vmem:[#allocation14 + $0x30] sm:$0xff] }
 0x3bc   : > { %v2080_v40 = vpop.eup %2079  ;;  %v917_v41 = vmul.f32 1.442695, %v914_v39  ;;  %v837_v45 = vmul.f32 1.442695, %v834_v42 }
 0x3bd   : > { %v839_v43 = vsel %vm751_vm1, %v2080_v40, 0.0 }
 0x3be   : > { %2081 = vpow2.f32 %v917_v41  ;;  %840 = vadd.xlane.f32.xlu1 %v839_v43  ;;  %v1912_v41 = vld [vmem:[#allocation11] sm:$0xff]  ;;  %v1813_v43 = vld [vmem:[#allocation12 + $0x70] sm:$0xf] }
 0x3bf   : > { %2083 = vpow2.f32 %v837_v45  ;;  %1123 = vmatpush.bf16.msrb.mxu1 %v1915_v37  ;;  %v1935_v45 = vld [vmem:[#allocation12 + $0x74] sm:$0xf0]  ;;  %v1950_v37 = vld [vmem:[#allocation14 + $0x70] sm:$0xff] }
 0x3c1   : > { %v989_v46 = vpop.xlane.xlu0 %988 }
 0x3c2   : > { %v993_v47 = vsub.f32 %v982_v30, %v989_v46  ;;  %v1934_v46 = vld [vmem:[#allocation12 + $0x74] sm:$0xf] }
 0x3c3   : > { %1124 = vmatpush.bf16.msrb.mxu1 %v1914_v38  ;;  %v1941_v38 = vld [vmem:[#allocation14 + $0x28] sm:$0xff] }
 0x3c4   : > { %v2082_v48 = vpop.eup %2081  ;;  %v995_v49 = vmul.f32 1.442695, %v993_v47  ;;  %v1814_v47 = vor.u32 %v1935_v45, %v1813_v43  ;;  %v2067_v43 = vld [vmem:[%s2770_s5] ss:$0 sm:$0xff] }
 0x3c5   : > { %v922_v50 = vsel %vm751_vm1, %v2082_v48, 0.0  ;;  %v2084_v52 = vpop.eup %2083 }
 0x3c6   : > { %2085 = vpow2.f32 %v995_v49  ;;  %923 = vadd.xlane.f32.xlu0 %v922_v50  ;;  %v842_v56 = vsel %vm751_vm1, %v2084_v52, 0.0  ;;  %v1805_v49 = vld [vmem:[#allocation12 + $0x60] sm:$0xf]  ;;  %v1933_v50 = vld [vmem:[#allocation12 + $0x64] sm:$0xf0] }
 0x3c9   : > { %v992_v51 = vpop.xlane.xlu2 %991 }
 0x3ca   : > { %v994_v53 = vsub.f32 %v984_v32, %v992_v51 }
 0x3cc   : > { %v2086_v54 = vpop.eup %2085  ;;  %v997_v55 = vmul.f32 1.442695, %v994_v53  ;;  %v1807_v53 = vld [vmem:[#allocation12 + $0x68] sm:$0xf0] }
 0x3cd   : > { %v999_v57 = vsel %vm751_vm1, %v2086_v54, 0.0 }
 0x3ce   : > { %2087 = vpow2.f32 %v997_v55  ;;  %843 = vadd.xlane.f32.xlu0 %v842_v56  ;;  %1000 = vadd.xlane.f32.xlu1 %v999_v57  ;;  %v1797_v56 = vld [vmem:[#allocation12 + $0x50] sm:$0xf]  ;;  %v1931_v57 = vld [vmem:[#allocation12 + $0x54] sm:$0xf0] }
 0x3d1   : > { %v851_v58 = vpop.permute.xlu2 %850 }
 0x3d2   : > { %863 = vmatpush.bf16.msrb.mxu0 %v851_v58 }
 0x3d4   : > { %v2088_v59 = vpop.eup %2087 }
 0x3d5   : > { %v1002_v60 = vsel %vm751_vm1, %v2088_v59, 0.0 }
 0x3d6   : > { %1003 = vadd.xlane.f32.xlu0 %v1002_v60  ;;  %v1799_v60 = vld [vmem:[#allocation12 + $0x58] sm:$0xf0] }
 0x3e7   : > { %930 = vrot.lane.b32.xlu1 %v2665_v44, %s2408_s28 }
 0x3ea   : > { %1010 = vrot.lane.b32.xlu0 %v2665_v44, %s2409_s11 }
 0x431   : > { %v841_v63 = vpop.xlane.xlu1 %840 }
 0x432   : > { %2089 = vrcp.f32 %v841_v63  ;;  %v1789_v63 = vld [vmem:[#allocation12 + $0x40] sm:$0xf] }
 0x438   : > { %v2090_v3 = vpop.eup %2089 }
 0x439   : > { %v924_v62 = vpop.xlane.xlu0 %923  ;;  %v847_v5 = vmul.f32 %v2090_v3, %v2080_v40  ;;  %v1913_v40 = vld [vmem:[#allocation11 + $0x8] sm:$0xff]  ;;  %v1928_v3 = vld [vmem:[#allocation12 + $0x44] sm:$0xf] }
 0x43a   : > { %1125 = vmatpush.bf16.msrb.mxu1 %v1913_v40  ;;  %v1940_v40 = vld [vmem:[#allocation14 + $0x20] sm:$0xff] }
 0x43e   : > { %1126 = vmatpush.bf16.msrb.mxu1 %v1912_v41  ;;  %v1948_v41 = vld [vmem:[#allocation14 + $0x60] sm:$0xff] }
 0x441   : > { %v844_v2 = vpop.xlane.xlu0 %843  ;;  %v1001_v9 = vpop.xlane.xlu1 %1000 }
 0x442   : > { %2091 = vrcp.f32 %v844_v2  ;;  %v1929_v2 = vld [vmem:[#allocation12 + $0x44] sm:$0xf0]  ;;  %1418 = vmatpush.bf16.msra.mxu1 %v1951_v35 }
 0x443   : > { %2093 = vrcp.f32 %v924_v62 }
 0x444   : > { %2095 = vrcp.f32 %v921_v61  ;;  %v1798_v61 = vor.u32 %v1931_v57, %v1797_v56  ;;  %v1945_v56 = vld [vmem:[#allocation14 + $0x48] sm:$0xff]  ;;  %v1936_v57 = vld [vmem:[#allocation14] sm:$0xff] }
 0x446   : > { %1419 = vmatpush.bf16.msra.mxu1 %v1950_v37 }
 0x448   : > { %v2092_v4 = vpop.eup %2091 }
 0x449   : > { %v848_v6 = vmul.f32 %v2092_v4, %v2084_v52  ;;  %v1004_v8 = vpop.xlane.xlu0 %1003  ;;  %v2094_v44 = vpop.eup %2093  ;;  %v1932_v52 = vld [vmem:[#allocation12 + $0x64] sm:$0xf]  ;;  %v1791_v4 = vld [vmem:[#allocation12 + $0x48] sm:$0xf0] }
 0x44a   : > { %2097 = vrcp.f32 %v1004_v8  ;;  %v2096_v10 = vpop.eup %2095  ;;  %v928_v12 = vmul.f32 %v2094_v44, %v2082_v48  ;;  %v1815_v48 = vld [vmem:[#allocation12 + $0x78] sm:$0xf0]  ;;  %v1810_v55 = vor.u32 %v1932_v52, %v1807_v53  ;;  %v1938_v53 = vld [vmem:[#allocation14 + $0x10] sm:$0xff] }
 0x44b   : > { %v849_v7 = vpack.c.bf16 %v848_v6, %v847_v5  ;;  %2099 = vrcp.f32 %v1001_v9  ;;  %v927_v14 = vmul.f32 %v2096_v10, %v2684_v22  ;;  %v1818_v51 = vor.u32 %v1934_v46, %v1815_v48  ;;  %v1781_v10 = vld [vmem:[#allocation12 + $0x30] sm:$0xf]  ;;  %v1947_v52 = vld [vmem:[#allocation14 + $0x58] sm:$0xff] }
 0x44c   : > { %v1790_v6 = vor.u32 %v1929_v2, %v1789_v63 }
 0x44d   : > { %1714 = vmatmul.msk.bf16.vlgmr.msrb.gmra.mxu0 %vm751_vm1, %v849_v7  ;;  %v929_v17 = vpack.c.bf16 %v928_v12, %v927_v14  ;;  %1252 = vmatpush.bf16.msra.mxu3 %v1818_v51  ;;  %v1794_v7 = vor.u32 %v1928_v3, %v1791_v4  ;;  %v1926_v12 = vld [vmem:[#allocation12 + $0x34] sm:$0xf]  ;;  %v1783_v14 = vld [vmem:[#allocation12 + $0x38] sm:$0xf0] }
 0x44e   : > { %v1939_v51 = vld [vmem:[#allocation14 + $0x18] sm:$0xff] }
 0x450   : > { %v2098_v11 = vpop.eup %2097 }
 0x451   : > { %v2100_v13 = vpop.eup %2099  ;;  %v1008_v16 = vmul.f32 %v2098_v11, %v2088_v59  ;;  %v1930_v59 = vld [vmem:[#allocation12 + $0x54] sm:$0xf]  ;;  %1253 = vmatpush.bf16.msra.mxu3 %v1810_v55  ;;  %v1927_v11 = vld [vmem:[#allocation12 + $0x34] sm:$0xf0]  ;;  %v1937_v55 = vld [vmem:[#allocation14 + $0x8] sm:$0xff] }
 0x452   : > { %v1007_v18 = vmul.f32 %v2100_v13, %v2086_v54  ;;  %v1806_v54 = vor.u32 %v1933_v50, %v1805_v49  ;;  %v1802_v62 = vor.u32 %v1930_v59, %v1799_v60  ;;  %v1782_v13 = vor.u32 %v1927_v11, %v1781_v10  ;;  %v2068_v11 = vld [vmem:[%s2774_s9] ss:$0 sm:$0xff] }
 0x454   : > { %v1009_v20 = vpack.c.bf16 %v1008_v16, %v1007_v18  ;;  %v1773_v16 = vld [vmem:[#allocation12 + $0x20] sm:$0xf]  ;;  %v1924_v18 = vld [vmem:[#allocation12 + $0x24] sm:$0xf] }
 0x455   : > { %1254 = vmatpush.bf16.msra.mxu3 %v1802_v62 }
 0x459   : > { %v931_v15 = vpop.permute.xlu1 %930  ;;  %1255 = vmatpush.bf16.msra.mxu3 %v1794_v7 }
 0x45a   : > { %943 = vmatpush.bf16.msra.mxu2 %v931_v15  ;;  %v1786_v15 = vor.u32 %v1926_v12, %v1783_v14 }
 0x45c   : > { %v1011_v19 = vpop.permute.xlu0 %1010 }
 0x45d   : > { %1716 = vmatmul.msk.bf16.vlgmr.msra.gmra.mxu2 %vm751_vm1, %v929_v17  ;;  %1023 = vmatpush.bf16.msra.mxu0 %v1011_v19  ;;  %v1925_v17 = vld [vmem:[#allocation12 + $0x24] sm:$0xf0] }
 0x45e   : > { %1238 = vmatpush.bf16.msrb.mxu2 %v1814_v47  ;;  %1256 = vmatpush.bf16.msra.mxu3 %v1786_v15  ;;  %v1774_v19 = vor.u32 %v1925_v17, %v1773_v16 }
 0x460   : > { %1718 = vmatmul.msk.bf16.vlgmr.msra.gmra.mxu0 %vm751_vm1, %v1009_v20  ;;  %v1775_v20 = vld [vmem:[#allocation12 + $0x28] sm:$0xf0] }
 0x461   : > { %1404 = vmatpush.bf16.msrb.mxu0 %v1943_v34 }
 0x462   : > { %1239 = vmatpush.bf16.msrb.mxu2 %v1806_v54  ;;  %v1946_v54 = vld [vmem:[#allocation14 + $0x50] sm:$0xff] }
 0x465   : > { %1405 = vmatpush.bf16.msrb.mxu0 %v1942_v36 }
 0x466   : > { %1240 = vmatpush.bf16.msrb.mxu2 %v1798_v61 }
 0x469   : > { %1406 = vmatpush.bf16.msrb.mxu0 %v1941_v38 }
 0x46a   : > { %1241 = vmatpush.bf16.msrb.mxu2 %v1790_v6 }
 0x46d   : > { %1407 = vmatpush.bf16.msrb.mxu0 %v1940_v40 }
 0x46e   : > { %1242 = vmatpush.bf16.msrb.mxu2 %v1782_v13 }
 0x471   : > { %1408 = vmatpush.bf16.msrb.mxu0 %v1939_v51 }
 0x472   : > { %1243 = vmatpush.bf16.msrb.mxu2 %v1774_v19 }
 0x475   : > { %1409 = vmatpush.bf16.msrb.mxu0 %v1938_v53 }
 0x479   : > { %1410 = vmatpush.bf16.msrb.mxu0 %v1937_v55 }
 0x47d   : > { %1411 = vmatpush.bf16.msrb.mxu0 %v1936_v57 }
 0x4ca   : > { %v865_v21 = vpop.f32.mrf.mxu0 }
 0x4cb   : > { %v870_v28 = vpack.c.bf16 %v865_v21, %v865_v21  ;;  %v1778_v21 = vor.u32 %v1924_v18, %v1775_v20 }
 0x4cd   : > { %1257 = vmatpush.bf16.msra.mxu3 %v1778_v21 }
 0x4d2   : > { %v867_v23 = vpop.f32.mrf.mxu0 }
 0x4d3   : > { %v871_v30 = vpack.c.bf16 %v867_v23, %v867_v23  ;;  %v1765_v23 = vld [vmem:[#allocation12 + $0x10] sm:$0xf] }
 0x4dd   : > { %v1025_v24 = vpop.f32.mrf.mxu0 }
 0x4de   : > { %v1030_v25 = vpack.c.bf16 %v1025_v24, %v1025_v24  ;;  %v1923_v24 = vld [vmem:[#allocation12 + $0x14] sm:$0xf0] }
 0x4e0   : > { %v945_v26 = vpop.f32.mrf.mxu2  ;;  %1034 = vrot.lane.b32.xlu1 %v1030_v25, %s2407_s19  ;;  %v1922_v25 = vld [vmem:[#allocation12 + $0x14] sm:$0xf] }
 0x4e1   : > { %v950_v22 = vpack.c.bf16 %v945_v26, %v945_v26  ;;  %v1766_v26 = vor.u32 %v1923_v24, %v1765_v23 }
 0x4e3   : > { %954 = vrot.lane.b32.xlu2 %v950_v22, %s2408_s28  ;;  %v1767_v22 = vld [vmem:[#allocation12 + $0x18] sm:$0xf0]  ;;  %1244 = vmatpush.bf16.msrb.mxu2 %v1766_v26 }
 0x4e5   : > { %v1027_v31 = vpop.f32.mrf.mxu0 }
 0x4e6   : > { %v1031_v32 = vpack.c.bf16 %v1027_v31, %v1027_v31 }
 0x4e8   : > { %v947_v27 = vpop.f32.mrf.mxu2 }
 0x4e9   : > { %v951_v29 = vpack.c.bf16 %v947_v27, %v947_v27  ;;  %v1770_v27 = vor.u32 %v1922_v25, %v1767_v22 }
 0x4eb   : > { %956 = vrot.lane.b32.xlu0 %v951_v29, %s2408_s28  ;;  %874 = vrot.lane.b32.xlu2 %v870_v28, %s2409_s11  ;;  %v1757_v28 = vld [vmem:[#allocation12] sm:$0xf]  ;;  %v1921_v29 = vld [vmem:[#allocation12 + $0x4] sm:$0xf0] }
 0x4ec   : > { %1258 = vmatpush.bf16.msra.mxu3 %v1770_v27  ;;  %v1758_v31 = vor.u32 %v1921_v29, %v1757_v28 }
 0x4ee   : > { %1245 = vmatpush.bf16.msrb.mxu2 %v1758_v31 }
 0x4f3   : > { %876 = vrot.lane.b32.xlu2 %v871_v30, %s2409_s11  ;;  %v1920_v30 = vld [vmem:[#allocation12 + $0x4] sm:$0xf] }
 0x4fb   : > { %1036 = vrot.lane.b32.xlu2 %v1031_v32, %s2407_s19  ;;  %v1759_v32 = vld [vmem:[#allocation12 + $0x8] sm:$0xf0]  ;;  %s2331_s19 = scalar_lea.hbm %s2775_s10, 32 }
 0x4fc   : > { %v1762_v33 = vor.u32 %v1920_v30, %v1759_v32  ;;  %p2333_p10 = scmp.lt.s32.totalorder %s2331_s19, %s2327_s24 }
 0x4fe   : > { %1259 = vmatpush.bf16.msra.mxu3 %v1762_v33  ;;  %p2334_p2 = por %p2333_p10, %p2332_p9 }
 0x500   : > { %p2335_p11 = pnand %p2334_p2, %p2330_p8 }
 0x53d   : > { %v955_v39 = vpop.permute.xlu2 %954 }
 0x545   : > { %v875_v42 = vpop.permute.xlu2 %874 }
 0x546   : > { %881 = vst.msk [vmem:[#allocation2] sm:$0xf] %vm880_vm3, %v875_v42 }
 0x547   : > { %961 = vst.msk [vmem:[#allocation2] sm:$0xf] %vm960_vm4, %v955_v39  ;;  %v1949_v39 = vld [vmem:[#allocation14 + $0x68] sm:$0xff] }
 0x548   : > { %1420 = vmatpush.bf16.msra.mxu1 %v1949_v39 }
 0x54c   : > { %1421 = vmatpush.bf16.msra.mxu1 %v1948_v41 }
 0x54d   : > { %v877_v58 = vpop.permute.xlu2 %876 }
 0x54e   : > { %882 = vst.msk [vmem:[#allocation2 + $0x4] sm:$0xf] %vm880_vm3, %v877_v58  ;;  %v1944_v58 = vld [vmem:[#allocation14 + $0x40] sm:$0xff] }
 0x550   : > { %1422 = vmatpush.bf16.msra.mxu1 %v1947_v52 }
 0x552   : > { %v1035_v5 = vpop.permute.xlu1 %1034 }
 0x553   : > { %1041 = vst.msk [vmem:[#allocation2] sm:$0xf] %vm1040_vm5, %v1035_v5 }
 0x554   : > { %1423 = vmatpush.bf16.msra.mxu1 %v1946_v54 }
 0x555   : > { %v1037_v9 = vpop.permute.xlu2 %1036 }
 0x558   : > { %1424 = vmatpush.bf16.msra.mxu1 %v1945_v56 }
 0x55c   : > { %1425 = vmatpush.bf16.msra.mxu1 %v1944_v58 }
 0x55d   : > { %v957_v8 = vpop.permute.xlu0 %956 }
 0x55e   : > { %962 = vst.msk [vmem:[#allocation2 + $0x4] sm:$0xf] %vm960_vm4, %v957_v8 }
 0x55f   : > { %1042 = vst.msk [vmem:[#allocation2 + $0x4] sm:$0xf] %vm1040_vm5, %v1037_v9 }
 0x566   : > { %v1911_v44 = vld [vmem:[#allocation2] sm:$0xff] }
 0x567   : > { %1127 = vmatmul.bf16.vlgmr.msrb.gmra.mxu1 %v1911_v44 }
 0x5e4   : > { %v1128_v42 = vpop.f32.mrf.mxu1 }
 0x5e5   : > { %v1129_v45 = vadd.f32 %v2067_v43, %v1128_v42 }
 0x5e7   : > { %v1133_v48 = vadd.f32 %v1129_v45, %v2655_v0  ;;  %v1152_v0 = vld [vmem:[%s2772_s7] sm:$0x3] }
 0x5e8   : > { %v1154_v60 = vperm.slane %v1152_v0, 0  ;;  %v1155_v61 = vperm.slane %v1152_v0, 1 }
 0x5ec   : > { %v1130_v46 = vpop.f32.mrf.mxu1 }
 0x5ed   : > { %v1131_v47 = vadd.f32 %v2067_v43, %v1130_v46 }
 0x5ef   : > { %v1134_v49 = vadd.f32 %v1131_v47, %v2657_v1 }
 0x5f1   : > { %v1135_v50 = vpack.c.bf16 %v1134_v49, %v1133_v48 }
 0x5f3   : > { %1246 = vmatmul.bf16.vlgmr.msrb.gmra.mxu2 %v1135_v50  ;;  %1260 = vmatmul.bf16.vlgmr.msra.gmra.mxu3 %v1135_v50 }
 0x676   : > { %v1247_v1 = vpop.f32.mrf.mxu2  ;;  %v1261_v59 = vpop.f32.mrf.mxu3 }
 0x677   : > { %v1248_v62 = vadd.f32 %v1247_v1, %v1154_v60  ;;  %v1262_v63 = vadd.f32 %v1261_v59, %v1155_v61 }
 0x679   : > { %v1266_v6 = vmax.f32 %v1248_v62, 0.0  ;;  %v1267_v7 = vmax.f32 %v1262_v63, 0.0 }
 0x67e   : > { %v1249_v2 = vpop.f32.mrf.mxu2  ;;  %v1263_v3 = vpop.f32.mrf.mxu3 }
 0x67f   : > { %v1250_v4 = vadd.f32 %v1249_v2, %v1154_v60  ;;  %v1264_v5 = vadd.f32 %v1263_v3, %v1155_v61 }
 0x681   : > { %v1268_v8 = vmax.f32 %v1250_v4, 0.0  ;;  %v1269_v9 = vmax.f32 %v1264_v5, 0.0 }
 0x683   : > { %v1270_v44 = vpack.c.bf16 %v1268_v8, %v1266_v6  ;;  %v1271_v10 = vpack.c.bf16 %v1269_v9, %v1267_v7 }
 0x685   : > { %1412 = vmatmul.bf16.vlgmr.msrb.gmra.mxu0 %v1270_v44  ;;  %1426 = vmatmul.bf16.vlgmr.msra.gmra.mxu1 %v1271_v10 }
 0x702   : > { %v1413_v12 = vpop.f32.mrf.mxu0  ;;  %v1427_v13 = vpop.f32.mrf.mxu1 }
 0x703   : > { %v1414_v14 = vadd.f32 %v2068_v11, %v1413_v12 }
 0x705   : > { %v1428_v15 = vadd.f32 %v1427_v13, %v1414_v14 }
 0x707   : > { %v1432_v16 = vadd.f32 %v1428_v15, %v1133_v48 }
 0x709   : > { %1434 = vst [vmem:[%s499_s21] sm:$0xff] %v1432_v16 }
 0x70a   : > { %v1415_v17 = vpop.f32.mrf.mxu0  ;;  %v1429_v19 = vpop.f32.mrf.mxu1 }
 0x70b   : > { %v1416_v18 = vadd.f32 %v2068_v11, %v1415_v17 }
 0x70d   : > { %v1430_v20 = vadd.f32 %v1429_v19, %v1416_v18 }
 0x70f   : > { %v1433_v21 = vadd.f32 %v1430_v20, %v1134_v49 }
 0x711   : > { %1435 = vst [vmem:[%s499_s21 + $0x8] sm:$0xff] %v1433_v21 }
 0x712   : > { %2338 = shalt.err (!%p2335_p11)
}
 0x713   : > { %s2410_s13 = smov 128   ;;  %s2411_s26 = smov 256  }
 0x714   : > { %s2412_s27 = smov 8  }
 0x715   : > { %1976 = dma.vmem_to_hbm [thread:$0]  (%p2564_p7), %s1449_s0, 256, %s1451_s3, %s1437_s4, %s2410_s13, %s2411_s26, %s2412_s27  }
 0x716 PF: > { %s2807_s20 = sld [smem:[#allocation22_spill]]  ;;  %p2809_p12 = scmp.ge.s32.totalorder %s2393_s16, 2 }
 0x718   : > { %p2002_p13 = pnand %p2809_p12, %p2503_p6 }
 0x71a   : > { %p2003_p0 = pneg %p2002_p13 }
 0x71c   : > { %s1465_s2 = sand.u32 1, %s2807_s20  }
 0x71d   : > { %s1466_s23 = scalar_lea.sflag [#allocation5], %s1465_s2 }
 0x71e   : > { %2376 = dma.done.wait (%p2003_p0), %s1466_s23, 256  }
 0x71f   : > { %2378 = vsyncadd (%p2003_p0), %s1466_s23, 4294967040  ;;  %s2810_s12 = sld [smem:[#allocation23_spill]]  ;;  %p28_p3 = scmp.ge.s32.totalorder %s2550_s25, 4  }
 0x720   : > { %s2811_s15 = sld [smem:[#allocation25_spill]]  ;;  %s2812_s13 = smov %s2385_s14 }
 0x721   : > { %s2814_s16 = smov %s2550_s25  ;;  %30 = sbr.rel (!%p28_p3) target bundleno = 16 (0x10), region = 138 }
 0x725   : > { %s2813_s14 = smov %s2810_s12 }
 0x726   :  { %1472 = vsyncpa [#allocation4], 1 }
 0x727   :  { %1474 = vsyncpa [#allocation4 + $0x1], 1 }
 0x728   :  { %1475 = vsyncpa [#allocation7], 1 }
 0x729   :  { %1477 = vsyncpa [#allocation7 + $0x1], 1 }
 0x72a   :  { %1478 = vsyncpa [#allocation10], 1 }
 0x72b   :  { %1479 = vsyncpa [#allocation13], 1 }
 0x72c   :  { %1480 = vsyncpa [#allocation5], 1 }
 0x72d   :  { %1482 = vsyncpa [#allocation5 + $0x1], 1 }

// kernel: tpu_custom_call.1
= control target key start
LH: loop header
LB: loop body
LE: loop exit
PB: predicated region body
PF: predicated region fallthrough
CT: control target
= control target key end

     0   :  { %s2765_s0 = inlined_call_operand.hbm [shape: f32[16,256], index: 0, kind: input, shape index: {}]   ;;  %s2766_s1 = inlined_call_operand.hbm [shape: f32[16,256], index: 1, kind: input, shape index: {}]   ;;  %s2767_s2 = inlined_call_operand.hbm [shape: bf16[128,384], index: 2, kind: input, shape index: {}]   ;;  %s2768_s3 = inlined_call_operand.hbm [shape: f32[1,384], index: 3, kind: input, shape index: {}]   ;;  %s2769_s4 = inlined_call_operand.hbm [shape: bf16[128,128], index: 4, kind: input, shape index: {}]   ;;  %s2770_s5 = inlined_call_operand.vmem [shape: f32[1,128], index: 5, kind: input, shape index: {}]   ;;  %s2771_s6 = inlined_call_operand.hbm [shape: bf16[128,256], index: 6, kind: input, shape index: {}]   ;;  %s2772_s7 = inlined_call_operand.vmem [shape: f32[1,256], index: 7, kind: input, shape index: {}]   ;;  %s2773_s8 = inlined_call_operand.hbm [shape: bf16[256,128], index: 8, kind: input, shape index: {}]   ;;  %s2774_s9 = inlined_call_operand.vmem [shape: f32[1,128], index: 9, kind: input, shape index: {}]   ;;  %s2775_s10 = inlined_call_operand.hbm [shape: f32[16,256], index: 10, kind: output, shape index: {}]  }
   0x1   :  { %2783 = sst [smem:[#allocation26_spill]] %s2765_s0 }
   0x2   :  { %2784 = sst [smem:[#allocation27_spill]] %s2767_s2 }
   0x3   :  { %2785 = sst [smem:[#allocation28_spill]] %s2768_s3 }
   0x4   :  { %2786 = sst [smem:[#allocation29_spill]] %s2769_s4 }
   0x5   :  { %2787 = sst [smem:[#allocation30_spill]] %s2771_s6 }
   0x6   :  { %2788 = sst [smem:[#allocation31_spill]] %s2773_s8 }
   0x7   :  { %15 = vsyncpa [#allocation4], 0 }
   0x8   :  { %17 = vsyncpa [#allocation4 + $0x1], 0 }
   0x9   :  { %18 = vsyncpa [#allocation7], 0 }
   0xa   :  { %20 = vsyncpa [#allocation7 + $0x1], 0 }
   0xb   :  { %21 = vsyncpa [#allocation10], 0 }
   0xc   :  { %22 = vsyncpa [#allocation13], 0 }
   0xd   :  { %23 = vsyncpa [#allocation5], 0 }
   0xe   :  { %25 = vsyncpa [#allocation5 + $0x1], 0  ;;  %s2468_s13 = smov 0   ;;  %s2470_s14 = smov 0  }
   0xf   :  { %s2472_s15 = smov 0   ;;  %s2474_s16 = smov 0  }
  0x10 LB: > { %2789 = sst [smem:[#allocation22_spill]] %s2381_s13  ;;  %s2489_s17 = sadd.s32 4294967295, %s2393_s16   ;;  %s2393_s16 = sphi %s2474_s16, %s2814_s16   ;;  %s2389_s15 = sphi %s2472_s15, %s2811_s15   ;;  %s2385_s14 = sphi %s2470_s14, %s2813_s14   ;;  %s2381_s13 = sphi %s2468_s13, %s2812_s13  }
  0x11   : > { %2790 = sst [smem:[#allocation23_spill]] %s2389_s15  ;;  %s1594_s18 = sadd.s32 4294967294, %s2393_s16  }
  0x12   : > { %p51_p0 = scmp.ne.s32.totalorder %s2385_s14, %s2381_s13  ;;  %p52_p1 = scmp.eq.s32.totalorder %s2489_s17, 0 }
  0x13   : > { %p269_p2 = scmp.eq.s32.totalorder %s2489_s17, 1  ;;  %p275_p3 = scmp.eq.s32.totalorder %s1594_s18, 1 }
  0x14   : > { %p2498_p4 = por %p52_p1, %p51_p0  ;;  %p1595_p5 = scmp.ge.s32.totalorder %s2393_s16, 1 }
  0x15   : > { %p2503_p6 = por %p275_p3, %p51_p0  ;;  %p282_p7 = scmp.lt.s32.totalorder %s2393_s16, 3 }
  0x16   : > { %s2794_s2 = sld [smem:[#allocation27_spill]]  ;;  %s2395_s25 = smov [#allocation8]  }
  0x17   : > { %s2792_s20 = scalar_select %p2503_p6, 1, 0 }
  0x18   : > { %p2511_p8 = pnand %p1595_p5, %p282_p7  ;;  %s295_s26 = sshll.u32 %s2395_s25, 4  ;;  %s296_s26 = int_to_ptr.vmem [resolvable:$true] %s295_s26 }
  0x19   : > { %2793 = sst [smem:[#allocation24_spill]] %s2792_s20  ;;  %s2396_s11 = smov 192  }
  0x1a   : > { %p1978_p9 = pneg %p2511_p8  ;;  %s2797_s3 = sld [smem:[#allocation28_spill]] }
  0x1b   : > { %s2397_s12 = smov 12   ;;  %s2398_s18 = smov [#allocation9]  }
  0x1c   : > { %s293_s23 = sshll.u32 %s2794_s2, 4  ;;  %p2519_p10 = pnand %p1978_p9, %p52_p1  ;;  %s294_s23 = int_to_ptr.hbm [resolvable:$true] %s293_s23 }
  0x1d   : > { %s310_s21 = sshll.u32 %s2398_s18, 4  ;;  %s2798_s6 = sld [smem:[#allocation30_spill]]  ;;  %s311_s21 = int_to_ptr.vmem [resolvable:$true] %s310_s21 }
  0x1e   : > { %1981 = dma.hbm_to_vmem [thread:$0]  (!%p2519_p10), %s294_s23, 3072, %s296_s26, [#allocation7], %s2396_s11, %s2396_s11, %s2397_s12  }
  0x1f   : > { %s2399_s20 = smov [#allocation12]   ;;  %s2799_s4 = sld [smem:[#allocation29_spill]] }
  0x20   : > { %s308_s30 = sshll.u32 %s2797_s3, 4  ;;  %s338_s28 = sshll.u32 %s2399_s20, 4  ;;  %s309_s30 = int_to_ptr.hbm [resolvable:$true] %s308_s30  ;;  %s339_s28 = int_to_ptr.vmem [resolvable:$true] %s338_s28 }
  0x21   : > { %1984 = dma.hbm_to_vmem [thread:$0]  (!%p2519_p10), %s309_s30, 48, %s311_s21, [#allocation10]  }
  0x22   : > { %s2778_s23 = smov 128   ;;  %s2780_s26 = smov 8  }
  0x23   : > { %s336_s2 = sshll.u32 %s2798_s6, 4  ;;  %s2402_s30 = smov [#allocation11]   ;;  %s337_s2 = int_to_ptr.hbm [resolvable:$true] %s336_s2 }
  0x24   : > { %1990 = dma.hbm_to_vmem [thread:$0]  (!%p2519_p10), %s337_s2, 2048, %s339_s28, [#allocation13], %s2778_s23, %s2778_s23, %s2780_s26  }
  0x25   : > { %s319_s13 = sshll.u32 %s2799_s4, 4  ;;  %s321_s20 = sshll.u32 %s2402_s30, 4  ;;  %s320_s13 = int_to_ptr.hbm [resolvable:$true] %s319_s13  ;;  %s322_s20 = int_to_ptr.vmem [resolvable:$true] %s321_s20 }
  0x26   : > { %s2403_s3 = smov 64   ;;  %s2404_s11 = smov 4  }
  0x27   : > { %1987 = dma.hbm_to_vmem [thread:$0]  (!%p2519_p10), %s320_s13, 1024, %s322_s20, [#allocation10], %s2403_s3, %s2403_s3, %s2404_s11  }
  0x28   : > { %s2800_s8 = sld [smem:[#allocation31_spill]]  ;;  %s2405_s2 = smov [#allocation14]  }
  0x29   : > { %s355_s22 = sshll.u32 %s2405_s2, 4  ;;  %s2550_s25 = sadd.s32 1, %s2393_s16   ;;  %s356_s22 = int_to_ptr.vmem [resolvable:$true] %s355_s22 }
  0x2a   : > { %s35_s28 = ssub.s32 %s2393_s16, %s2550_s25  ;;  %s38_s29 = sadd.s32 1, %s2389_s15 }
  0x2b   : > { %p36_p12 = scmp.eq.s32.totalorder %s35_s28, 0  ;;  %p45_p13 = scmp.ne.s32.totalorder %s2389_s15, %s2385_s14 }
  0x2c   : > { %p46_p0 = scmp.eq.s32.totalorder %s2393_s16, 0  ;;  %p2010_p3 = scmp.lt.s32.totalorder %s2393_s16, 2 }
  0x2d   : > { %s2560_s13 = scalar_select %p36_p12, %s2389_s15, %s38_s29  }
  0x2e   : > { %s353_s21 = sshll.u32 %s2800_s8, 4  ;;  %p47_p5 = por %p46_p0, %p45_p13  ;;  %s354_s21 = int_to_ptr.hbm [resolvable:$true] %s353_s21 }
  0x2f   : > { %1993 = dma.hbm_to_vmem [thread:$0]  (!%p2519_p10), %s354_s21, 2048, %s356_s22, [#allocation13], %s2403_s3, %s2403_s3, %s2404_s11  }
  0x30   : > { %2801 = sst [smem:[#allocation25_spill]] %s2560_s13  ;;  %p2564_p7 = por %p269_p2, %p45_p13 }
  0x31   : > { %s372_s27 = sand.u32 1, %s2389_s15   ;;  %s1603_s20 = sshll.u32 %s2393_s16, 3 }
  0x32   : > { %s2570_s3 = sshll.u32 %s372_s27, 4  ;;  %s2803_s0 = sld [smem:[#allocation26_spill]] }
  0x33   : > { %s376_s2 = scalar_lea.vmem [#allocation3], %s2570_s3  ;;  %p2578_p9 = pnand %p2010_p3, %p47_p5 }
  0x34   : > { %s383_s22 = sshll.u32 %s376_s2, 4  ;;  %s401_s26 = scalar_lea.hbm %s2766_s1, %s1603_s20  ;;  %s384_s22 = int_to_ptr.vmem [resolvable:$true] %s383_s22 }
  0x35   : > { %s402_s4 = sshll.u32 %s401_s26, 4  ;;  %s373_s11 = scalar_lea.sflag [#allocation4], %s372_s27  ;;  %s403_s4 = int_to_ptr.hbm [resolvable:$true] %s402_s4 }
  0x36   : > { %p2255_p10 = pneg %p2578_p9 }
  0x38   : > { %s380_s18 = scalar_lea.hbm %s2803_s0, %s1603_s20  ;;  %s2258_s8 = scalar_lea.hbm %s2803_s0, 32 }
  0x39   : > { %s381_s21 = sshll.u32 %s380_s18, 4  ;;  %s382_s21 = int_to_ptr.hbm [resolvable:$true] %s381_s21 }
  0x3a   : > { %s2251_s12 = sshra.s32 %s382_s21, 4  ;;  %s2252_s12 = int_to_ptr.hbm [resolvable:$true] %s2251_s12 }
  0x3b   : > { %s2253_s18 = scalar_lea.hbm %s2252_s12, 16  ;;  %p2259_p0 = scmp.lt.s32.totalorder %s2252_s12, %s2803_s0 }
  0x3c   : > { %p2254_p2 = scmp.ne.s32.totalorder %s2252_s12, %s2253_s18  ;;  %p2260_p3 = scmp.lt.s32.totalorder %s2258_s8, %s2253_s18 }
  0x3e   : > { %p2256_p12 = pnand %p2255_p10, %p2254_p2  ;;  %p2261_p5 = por %p2260_p3, %p2259_p0 }
  0x40   : > { %p2257_p13 = pneg %p2256_p12 }
  0x42   : > { %p2262_p11 = pnand %p2261_p5, %p2257_p13 }
  0x44   : > { %2265 = shalt.err (!%p2262_p11)
}
  0x45   : > { %s2406_s26 = smov 256   ;;  %s2805_s27 = smov 8  }
  0x46   : > { %s2806_s20 = smov 128   ;;  %s397_s6 = scalar_lea.vmem [#allocation6], %s2570_s3 }
  0x47   : > { %1997 = dma.hbm_to_vmem [thread:$0]  (!%p2578_p9), %s382_s21, 256, %s384_s22, %s373_s11, %s2406_s26, %s2806_s20, %s2805_s27  }
  0x48   : > { %s404_s2 = sshll.u32 %s397_s6, 4  ;;  %s393_s13 = sand.u32 1, %s2393_s16   ;;  %s405_s2 = int_to_ptr.vmem [resolvable:$true] %s404_s2 }
  0x49   : > { %s394_s23 = scalar_lea.sflag [#allocation7], %s393_s13  ;;  %s2281_s12 = sshra.s32 %s403_s4, 4  ;;  %s2282_s12 = int_to_ptr.hbm [resolvable:$true] %s2281_s12 }
  0x4a   : > { %s2283_s8 = scalar_lea.hbm %s2282_s12, 16  ;;  %s2288_s0 = scalar_lea.hbm %s2766_s1, 32 }
  0x4b   : > { %p2284_p2 = scmp.ne.s32.totalorder %s2282_s12, %s2283_s8  ;;  %p2289_p13 = scmp.lt.s32.totalorder %s2282_s12, %s2766_s1 }
  0x4c   : > { %p2290_p0 = scmp.lt.s32.totalorder %s2288_s0, %s2283_s8 }
  0x4d   : > { %p2286_p11 = pnand %p2284_p2, %p2255_p10 }
  0x4e   : > { %p2291_p3 = por %p2290_p0, %p2289_p13 }
  0x4f   : > { %p2287_p12 = pneg %p2286_p11 }
  0x51   : > { %p2292_p5 = pnand %p2291_p3, %p2287_p12 }
  0x53   : > { %2295 = shalt.err (!%p2292_p5)
}
  0x54   : > { %2000 = dma.hbm_to_vmem [thread:$0]  (!%p2578_p9), %s403_s4, 256, %s405_s2, %s394_s23, %s2406_s26, %s2806_s20, %s2805_s27  }
  0x55   : > { %416 = sbr.rel (%p2511_p8) target bundleno = 1814 (0x716), region = 60  ;;  %s2618_s13 = sand.u32 (!%p2511_p8), 1, %s2385_s14  }
  0x56   : > { %s2621_s15 = sshll.u32 (!%p2511_p8), %s2618_s13, 4  ;;  %s419_s0 = scalar_lea.sflag (!%p2511_p8), [#allocation4], %s2618_s13 }
  0x57   : > { %s422_s3 = scalar_lea.vmem (!%p2511_p8), [#allocation3], %s2621_s15 }
  0x5a   : > { %2356 = dma.done.wait (%p2498_p4), %s419_s0, 256  }
  0x5b   : > { %2358 = vsyncadd (%p2498_p4), %s419_s0, 4294967040  ;;  %s428_s4 = sand.u32 1, %s2489_s17   ;;  %s432_s22 = scalar_lea.vmem [#allocation6], %s2621_s15 }
  0x5c   : > { %s429_s24 = scalar_lea.sflag [#allocation7], %s428_s4 }
  0x5d   : > { %2360 = dma.done.wait (%p2498_p4), %s429_s24, 256  }
  0x5e   : > { %2362 = vsyncadd (%p2498_p4), %s429_s24, 4294967040 }
  0x5f   : > { %2364 = dma.done.wait (%p52_p1), [#allocation7], 3072  }
  0x60   : > { %2366 = vsyncadd (%p52_p1), [#allocation7], 4294964224 }
  0x61   : > { %2368 = dma.done.wait (%p52_p1), [#allocation10], 1072  }
  0x62   : > { %2370 = vsyncadd (%p52_p1), [#allocation10], 4294966224 }
  0x63   : > { %2372 = dma.done.wait (%p52_p1), [#allocation13], 4096  }
  0x64   : > { %2374 = vsyncadd (%p52_p1), [#allocation13], 4294963200  ;;  %v1701_v0 = vld [vmem:[#allocation8 + $0xa8] sm:$0xf]  ;;  %v1909_v1 = vld [vmem:[#allocation8 + $0xb0] sm:$0xf0] }
  0x65   : > { %v1908_v2 = vld [vmem:[#allocation8 + $0xac] sm:$0xf]  ;;  %v1702_v3 = vor.u32 %v1909_v1, %v1701_v0  ;;  %v1703_v4 = vld [vmem:[#allocation8 + $0xb4] sm:$0xf0]  ;;  %v1689_v5 = vld [vmem:[#allocation8 + $0x90] sm:$0xf] }
  0x66   : > { %v1906_v6 = vld [vmem:[#allocation8 + $0x98] sm:$0xf0]  ;;  %v1706_v7 = vor.u32 %v1908_v2, %v1703_v4  ;;  %v1905_v8 = vld [vmem:[#allocation8 + $0x94] sm:$0xf]  ;;  %v1691_v9 = vld [vmem:[#allocation8 + $0x9c] sm:$0xf0] }
  0x67   : > { %676 = vmatpush.bf16.msra.mxu0 %v1702_v3  ;;  %v1690_v10 = vor.u32 %v1906_v6, %v1689_v5  ;;  %v1694_v11 = vor.u32 %v1905_v8, %v1691_v9  ;;  %v1677_v12 = vld [vmem:[#allocation8 + $0x78] sm:$0xf]  ;;  %v1903_v13 = vld [vmem:[#allocation8 + $0x80] sm:$0xf0]  ;;  %v1902_v14 = vld [vmem:[#allocation8 + $0x7c] sm:$0xf] }
  0x68   : > { %690 = vmatpush.bf16.msra.mxu1 %v1706_v7  ;;  %v1679_v15 = vld [vmem:[#allocation8 + $0x84] sm:$0xf0]  ;;  %v1678_v16 = vor.u32 %v1903_v13, %v1677_v12  ;;  %v1665_v18 = vld [vmem:[#allocation8 + $0x60] sm:$0xf]  ;;  %v1900_v19 = vld [vmem:[#allocation8 + $0x68] sm:$0xf0] }
  0x69   : > { %v1682_v17 = vor.u32 %v1902_v14, %v1679_v15  ;;  %v1899_v20 = vld [vmem:[#allocation8 + $0x64] sm:$0xf]  ;;  %v1667_v21 = vld [vmem:[#allocation8 + $0x6c] sm:$0xf0]  ;;  %v1666_v22 = vor.u32 %v1900_v19, %v1665_v18  ;;  %v1653_v23 = vld [vmem:[#allocation8 + $0x48] sm:$0xf] }
  0x6a   : > { %v1897_v24 = vld [vmem:[#allocation8 + $0x50] sm:$0xf0]  ;;  %v1670_v25 = vor.u32 %v1899_v20, %v1667_v21  ;;  %v1709_v26 = vld [vmem:[#allocation8 + $0xb0] sm:$0xf]  ;;  %v1910_v27 = vld [vmem:[#allocation8 + $0xb8] sm:$0xf0] }
  0x6b   : > { %677 = vmatpush.bf16.msra.mxu0 %v1690_v10  ;;  %v1697_v28 = vld [vmem:[#allocation8 + $0x98] sm:$0xf]  ;;  %v1896_v29 = vld [vmem:[#allocation8 + $0x4c] sm:$0xf]  ;;  %v1710_v31 = vor.u32 %v1910_v27, %v1709_v26  ;;  %v1907_v32 = vld [vmem:[#allocation8 + $0xa0] sm:$0xf0]  ;;  %v1654_v33 = vor.u32 %v1897_v24, %v1653_v23 }
  0x6c   : > { %691 = vmatpush.bf16.msra.mxu1 %v1694_v11  ;;  %v1655_v30 = vld [vmem:[#allocation8 + $0x54] sm:$0xf0]  ;;  %v1641_v34 = vld [vmem:[#allocation8 + $0x30] sm:$0xf]  ;;  %v1698_v35 = vor.u32 %v1907_v32, %v1697_v28  ;;  %v1894_v37 = vld [vmem:[#allocation8 + $0x38] sm:$0xf0] }
  0x6d   : > { %704 = vmatpush.bf16.msra.mxu2 %v1710_v31  ;;  %v1658_v36 = vor.u32 %v1896_v29, %v1655_v30  ;;  %v1685_v38 = vld [vmem:[#allocation8 + $0x80] sm:$0xf]  ;;  %v1904_v39 = vld [vmem:[#allocation8 + $0x88] sm:$0xf0]  ;;  %v1893_v40 = vld [vmem:[#allocation8 + $0x34] sm:$0xf]  ;;  %v1642_v42 = vor.u32 %v1894_v37, %v1641_v34 }
  0x6e   : > { %v1643_v41 = vld [vmem:[#allocation8 + $0x3c] sm:$0xf0]  ;;  %v1629_v43 = vld [vmem:[#allocation8 + $0x18] sm:$0xf]  ;;  %v1686_v44 = vor.u32 %v1904_v39, %v1685_v38  ;;  %v1891_v46 = vld [vmem:[#allocation8 + $0x20] sm:$0xf0] }
  0x6f   : > { %678 = vmatpush.bf16.msra.mxu0 %v1678_v16  ;;  %v1646_v45 = vor.u32 %v1893_v40, %v1643_v41  ;;  %v1673_v47 = vld [vmem:[#allocation8 + $0x68] sm:$0xf]  ;;  %v1901_v48 = vld [vmem:[#allocation8 + $0x70] sm:$0xf0]  ;;  %v1890_v49 = vld [vmem:[#allocation8 + $0x1c] sm:$0xf]  ;;  %v1630_v53 = vor.u32 %v1891_v46, %v1629_v43 }
  0x70   : > { %692 = vmatpush.bf16.msra.mxu1 %v1682_v17  ;;  %v1631_v50 = vld [vmem:[#allocation8 + $0x24] sm:$0xf0]  ;;  %v1617_v51 = vld [vmem:[#allocation8] sm:$0xf]  ;;  %v1674_v57 = vor.u32 %v1901_v48, %v1673_v47  ;;  %v1888_v59 = vld [vmem:[#allocation8 + $0x8] sm:$0xf0] }
  0x71   : > { %705 = vmatpush.bf16.msra.mxu2 %v1698_v35  ;;  %v501_v52 = vld [vmem:[%s422_s3] sm:$0xff]  ;;  %v502_v54 = vld [vmem:[%s422_s3 + $0x8] sm:$0xff]  ;;  %v1634_v58 = vor.u32 %v1890_v49, %v1631_v50  ;;  %v1618_v2 = vor.u32 %v1888_v59, %v1617_v51  ;;  %vm730_vm0 = vcmask 261120   ;;  %s2407_s19 = smov 96   ;;  %s2408_s28 = smov 64   ;;  %vm751_vm1 = vcmask 130048  }
  0x72   : > { %v503_v55 = vld [vmem:[%s432_s22] sm:$0xff]  ;;  %v504_v56 = vld [vmem:[%s432_s22 + $0x8] sm:$0xff]  ;;  %s2409_s11 = smov 32   ;;  %vm800_vm2 = vcmask 257024   ;;  %vm880_vm3 = vcmask 519424   ;;  %vm960_vm4 = vcmask 781824  }
  0x73   : > { %679 = vmatpush.bf16.msra.mxu0 %v1666_v22  ;;  %v1661_v60 = vld [vmem:[#allocation8 + $0x50] sm:$0xf]  ;;  %v1898_v61 = vld [vmem:[#allocation8 + $0x58] sm:$0xf0]  ;;  %v1887_v62 = vld [vmem:[#allocation8 + $0x4] sm:$0xf]  ;;  %v2655_v0 = vadd.f32 %v503_v55, %v501_v52  ;;  %v2657_v1 = vadd.f32 %v504_v56, %v502_v54 }
  0x74   : > { %693 = vmatpush.bf16.msra.mxu1 %v1670_v25  ;;  %v1619_v63 = vld [vmem:[#allocation8 + $0xc] sm:$0xf0]  ;;  %v1662_v3 = vor.u32 %v1898_v61, %v1661_v60  ;;  %v1649_v5 = vld [vmem:[#allocation8 + $0x38] sm:$0xf]  ;;  %v1895_v6 = vld [vmem:[#allocation8 + $0x40] sm:$0xf0] }
  0x75   : > { %706 = vmatpush.bf16.msra.mxu2 %v1686_v44  ;;  %v1622_v4 = vor.u32 %v1887_v62, %v1619_v63  ;;  %v507_v7 = vpack.c.bf16 %v2657_v1, %v2655_v0  ;;  %v1650_v8 = vor.u32 %v1895_v6, %v1649_v5  ;;  %v1637_v9 = vld [vmem:[#allocation8 + $0x20] sm:$0xf]  ;;  %v1892_v10 = vld [vmem:[#allocation8 + $0x28] sm:$0xf0]  ;;  %v1625_v12 = vld [vmem:[#allocation8 + $0x8] sm:$0xf] }
  0x76   : > { %v1638_v11 = vor.u32 %v1892_v10, %v1637_v9  ;;  %v1889_v13 = vld [vmem:[#allocation8 + $0x10] sm:$0xf0]  ;;  %v540_v15 = vld [vmem:[#allocation9] sm:$0x7]  ;;  %vm1040_vm5 = vcmask 1044224   ;;  %s1884_s12 = sshll.u32 %s2489_s17, 3 }
  0x77   : > { %680 = vmatpush.bf16.msra.mxu0 %v1654_v33  ;;  %v1626_v14 = vor.u32 %v1889_v13, %v1625_v12  ;;  %v542_v18 = vperm.slane %v540_v15, 0  ;;  %v543_v19 = vperm.slane %v540_v15, 1  ;;  %v544_v31 = vperm.slane %v540_v15, 2  ;;  %s1447_s29 = scalar_lea.hbm %s2775_s10, %s1884_s12  ;;  %s499_s21 = scalar_lea.vmem [#allocation15], %s2621_s15 }
  0x78   : > { %694 = vmatpush.bf16.msra.mxu1 %v1658_v36  ;;  %s1448_s0 = sshll.u32 %s499_s21, 4  ;;  %s1450_s3 = sshll.u32 %s1447_s29, 4  ;;  %s1449_s0 = int_to_ptr.vmem [resolvable:$true] %s1448_s0  ;;  %s1451_s3 = int_to_ptr.hbm [resolvable:$true] %s1450_s3 }
  0x79   : > { %707 = vmatpush.bf16.msra.mxu2 %v1674_v57  ;;  %s1437_s4 = scalar_lea.sflag [#allocation5], %s2618_s13  ;;  %s2325_s17 = sshra.s32 %s1451_s3, 4  ;;  %s2326_s17 = int_to_ptr.hbm [resolvable:$true] %s2325_s17 }
  0x7a   : > { %s2327_s24 = scalar_lea.hbm %s2326_s17, 16  ;;  %p2332_p9 = scmp.lt.s32.totalorder %s2326_s17, %s2775_s10 }
  0x7b   : > { %681 = vmatpush.bf16.msra.mxu0 %v1642_v42  ;;  %p2328_p1 = scmp.ne.s32.totalorder %s2326_s17, %s2327_s24 }
  0x7c   : > { %695 = vmatpush.bf16.msra.mxu1 %v1646_v45 }
  0x7d   : > { %708 = vmatpush.bf16.msra.mxu2 %v1662_v3  ;;  %p2329_p4 = pnand %p2328_p1, %p2564_p7 }
  0x7f   : > { %682 = vmatpush.bf16.msra.mxu0 %v1630_v53  ;;  %p2330_p8 = pneg %p2329_p4 }
  0x80   : > { %696 = vmatpush.bf16.msra.mxu1 %v1634_v58 }
  0x81   : > { %709 = vmatpush.bf16.msra.mxu2 %v1650_v8 }
  0x83   : > { %683 = vmatpush.bf16.msra.mxu0 %v1618_v2 }
  0x84   : > { %697 = vmatpush.bf16.msra.mxu1 %v1622_v4 }
  0x85   : > { %710 = vmatpush.bf16.msra.mxu2 %v1638_v11 }
  0x86   : > { %684 = vmatmul.bf16.vlgmr.msra.gmra.mxu0 %v507_v7 }
  0x87   : > { %698 = vmatmul.bf16.vlgmr.msra.gmra.mxu1 %v507_v7 }
  0x89   : > { %711 = vmatpush.bf16.msra.mxu2 %v1626_v14 }
  0x8c   : > { %712 = vmatmul.bf16.vlgmr.msra.gmra.mxu2 %v507_v7 }
 0x103   : > { %v685_v16 = vpop.f32.mrf.mxu0 }
 0x104   : > { %v699_v17 = vpop.f32.mrf.mxu1  ;;  %v686_v20 = vadd.f32 %v685_v16, %v542_v18 }
 0x105   : > { %v700_v21 = vadd.f32 %v699_v17, %v543_v19 }
 0x107   : > { %v718_v25 = vpack.c.bf16 %v700_v21, %v686_v20 }
 0x109   : > { %v727_v28 = vunpack.c.h.b16 %v718_v25  ;;  %v724_v36 = vunpack.c.l.b16 %v718_v25 }
 0x10b   : > { %v687_v22 = vpop.f32.mrf.mxu0 }
 0x10c   : > { %v688_v23 = vadd.f32 %v687_v22, %v542_v18  ;;  %v701_v24 = vpop.f32.mrf.mxu1 }
 0x10d   : > { %v702_v26 = vadd.f32 %v701_v24, %v543_v19 }
 0x10f   : > { %v720_v27 = vpack.c.bf16 %v702_v26, %v688_v23  ;;  %v713_v33 = vpop.f32.mrf.mxu2 }
 0x110   : > { %v714_v35 = vadd.f32 %v713_v33, %v544_v31 }
 0x111   : > { %v728_v29 = vunpack.c.h.b16 %v720_v27  ;;  %v725_v34 = vunpack.c.l.b16 %v720_v27 }
 0x112   : > { %v719_v38 = vpack.c.bf16 %v714_v35, %v714_v35 }
 0x113   : > { %v729_v30 = vpack.c.b16 %v728_v29, %v727_v28  ;;  %v726_v37 = vpack.c.b16 %v725_v34, %v724_v36 }
 0x114   : > { %v777_v41 = vunpack.c.l.b16 %v719_v38 }
 0x115   : > { %805 = vrot.lane.b32.xlu2 %v729_v30, %s2407_s19  ;;  %v735_v32 = vsel %vm730_vm0, %v729_v30, 0 }
 0x116   : > { %744 = vmatpush.bf16.xpose.msra.mxu3 %v735_v32 }
 0x117   : > { %v715_v39 = vpop.f32.mrf.mxu2 }
 0x118   : > { %v716_v40 = vadd.f32 %v715_v39, %v544_v31 }
 0x11a   : > { %v721_v42 = vpack.c.bf16 %v716_v40, %v716_v40 }
 0x11c   : > { %v778_v43 = vunpack.c.l.b16 %v721_v42 }
 0x11d   : > { %803 = vrot.lane.b32.xlu2 %v726_v37, %s2407_s19  ;;  %1711 = vmatmul.msk.bf16.vlgmr.msra.gmra.mxu3 %vm730_vm0, %v726_v37 }
 0x11e   : > { %v2665_v44 = vpack.c.b16 %v778_v43, %v777_v41 }
 0x120   : > { %791 = vmatpush.bf16.msrb.mxu3 %v2665_v44 }
 0x125   : > { %883 = vrot.lane.b32.xlu2 %v726_v37, %s2408_s28 }
 0x12d   : > { %963 = vrot.lane.b32.xlu2 %v726_v37, %s2409_s11 }
 0x16f   : > { %v806_v45 = vpop.permute.xlu2 %805 }
 0x170   : > { %v811_v46 = vsel %vm730_vm0, %v806_v45, 0 }
 0x171   : > { %820 = vmatpush.bf16.xpose.msra.mxu3 %v811_v46 }
 0x177   : > { %v804_v61 = vpop.permute.xlu2 %803 }
 0x17f   : > { %v884_v2 = vpop.permute.xlu2 %883 }
 0x187   : > { %v964_v14 = vpop.permute.xlu2 %963 }
 0x1a0   : > { %v746_v47 = vpop.f32.mrf.mxu3 }
 0x1a1   : > { %v752_v48 = vsel %vm751_vm1, %v746_v47, -inf }
 0x1a2   : > { %753 = vmax.xlane.f32.xlu0 %v752_v48 }
 0x1a8   : > { %v748_v49 = vpop.f32.mrf.mxu3 }
 0x1a9   : > { %v755_v50 = vsel %vm751_vm1, %v748_v49, -inf }
 0x1aa   : > { %756 = vmax.xlane.f32.xlu0 %v755_v50 }
 0x1be   : > { %885 = vrot.lane.b32.xlu0 %v729_v30, %s2408_s28 }
 0x215   : > { %v754_v51 = vpop.xlane.xlu0 %753 }
 0x216   : > { %v758_v52 = vsub.f32 %v746_v47, %v754_v51 }
 0x218   : > { %v760_v53 = vmul.f32 1.442695, %v758_v52 }
 0x21a   : > { %2069 = vpow2.f32 %v760_v53 }
 0x21d   : > { %v757_v54 = vpop.xlane.xlu0 %756 }
 0x21e   : > { %v759_v55 = vsub.f32 %v748_v49, %v757_v54 }
 0x220   : > { %v2070_v56 = vpop.eup %2069  ;;  %v762_v57 = vmul.f32 1.442695, %v759_v55 }
 0x221   : > { %v764_v58 = vsel %vm751_vm1, %v2070_v56, 0.0 }
 0x222   : > { %2071 = vpow2.f32 %v762_v57  ;;  %765 = vadd.xlane.f32.xlu1 %v764_v58 }
 0x228   : > { %v2072_v59 = vpop.eup %2071 }
 0x229   : > { %v767_v60 = vsel %vm751_vm1, %v2072_v59, 0.0 }
 0x22a   : > { %768 = vadd.xlane.f32.xlu1 %v767_v60 }
 0x230   : > { %v886_v62 = vpop.permute.xlu0 %885 }
 0x231   : > { %v891_v63 = vsel %vm730_vm0, %v886_v62, 0 }
 0x232   : > { %900 = vmatpush.bf16.xpose.msrb.mxu2 %v891_v63 }
 0x239   : > { %1715 = vmatmul.msk.bf16.vlgmr.msrb.gmra.mxu2 %vm730_vm0, %v884_v2 }
 0x243   : > { %965 = vrot.lane.b32.xlu1 %v729_v30, %s2409_s11 }
 0x295   : > { %v766_v3 = vpop.xlane.xlu1 %765 }
 0x296   : > { %2073 = vrcp.f32 %v766_v3 }
 0x29c   : > { %v2074_v5 = vpop.eup %2073 }
 0x29d   : > { %v769_v4 = vpop.xlane.xlu1 %768  ;;  %v772_v7 = vmul.f32 %v2074_v5, %v2070_v56 }
 0x29e   : > { %2075 = vrcp.f32 %v769_v4 }
 0x2a4   : > { %v2076_v6 = vpop.eup %2075 }
 0x2a5   : > { %v773_v8 = vmul.f32 %v2076_v6, %v2072_v59 }
 0x2a7   : > { %v774_v9 = vpack.c.bf16 %v773_v8, %v772_v7 }
 0x2a9   : > { %1712 = vmatmul.msk.bf16.vlgmr.msrb.gmra.mxu3 %vm751_vm1, %v774_v9 }
 0x2b5   : > { %v966_v10 = vpop.permute.xlu1 %965 }
 0x2b6   : > { %v971_v11 = vsel %vm730_vm0, %v966_v10, 0 }
 0x2b7   : > { %980 = vmatpush.bf16.xpose.msrb.mxu3 %v971_v11 }
 0x2b9   : > { %1713 = vmatmul.msk.bf16.vlgmr.msra.gmra.mxu3 %vm730_vm0, %v804_v61 }
 0x2bc   : > { %v902_v12 = vpop.f32.mrf.mxu2 }
 0x2bd   : > { %v907_v13 = vsel %vm751_vm1, %v902_v12, -inf }
 0x2be   : > { %908 = vmax.xlane.f32.xlu1 %v907_v13 }
 0x2c4   : > { %v904_v26 = vpop.f32.mrf.mxu2 }
 0x2c5   : > { %v910_v29 = vsel %vm751_vm1, %v904_v26, -inf }
 0x2c9   : > { %1717 = vmatmul.msk.bf16.vlgmr.msrb.gmra.mxu3 %vm730_vm0, %v964_v14 }
 0x32c   : > { %v793_v15 = vpop.f32.mrf.mxu3 }
 0x32d   : > { %v798_v16 = vpack.c.bf16 %v793_v15, %v793_v15 }
 0x32f   : > { %801 = vst.msk [vmem:[#allocation2] sm:$0xf] %vm800_vm2, %v798_v16 }
 0x331   : > { %v909_v17 = vpop.xlane.xlu1 %908 }
 0x332   : > { %v913_v18 = vsub.f32 %v902_v12, %v909_v17 }
 0x334   : > { %v915_v19 = vmul.f32 1.442695, %v913_v18  ;;  %v795_v20 = vpop.f32.mrf.mxu3 }
 0x335   : > { %v799_v21 = vpack.c.bf16 %v795_v20, %v795_v20 }
 0x336   : > { %2077 = vpow2.f32 %v915_v19 }
 0x337   : > { %802 = vst.msk [vmem:[#allocation2 + $0x4] sm:$0xf] %vm800_vm2, %v799_v21 }
 0x33c   : > { %v2684_v22 = vpop.eup %2077  ;;  %v822_v23 = vpop.f32.mrf.mxu3 }
 0x33d   : > { %v827_v24 = vsel %vm751_vm1, %v822_v23, -inf  ;;  %v919_v25 = vsel %vm751_vm1, %v2684_v22, 0.0 }
 0x33e   : > { %828 = vmax.xlane.f32.xlu2 %v827_v24  ;;  %920 = vadd.xlane.f32.xlu1 %v919_v25 }
 0x344   : > { %v824_v27 = vpop.f32.mrf.mxu3 }
 0x345   : > { %v830_v28 = vsel %vm751_vm1, %v824_v27, -inf }
 0x346   : > { %831 = vmax.xlane.f32.xlu0 %v830_v28  ;;  %911 = vmax.xlane.f32.xlu2 %v910_v29 }
 0x34c   : > { %v982_v30 = vpop.f32.mrf.mxu3 }
 0x34d   : > { %v987_v31 = vsel %vm751_vm1, %v982_v30, -inf }
 0x34e   : > { %988 = vmax.xlane.f32.xlu0 %v987_v31 }
 0x354   : > { %v984_v32 = vpop.f32.mrf.mxu3 }
 0x355   : > { %v990_v33 = vsel %vm751_vm1, %v984_v32, -inf }
 0x356   : > { %991 = vmax.xlane.f32.xlu2 %v990_v33  ;;  %v1919_v33 = vld [vmem:[#allocation11 + $0x38] sm:$0xff] }
 0x357   : > { %1119 = vmatpush.bf16.msrb.mxu1 %v1919_v33 }
 0x36e   : > { %850 = vrot.lane.b32.xlu2 %v2665_v44, %s2407_s19 }
 0x3b1   : > { %v829_v34 = vpop.xlane.xlu2 %828  ;;  %v921_v61 = vpop.xlane.xlu1 %920 }
 0x3b2   : > { %v833_v35 = vsub.f32 %v822_v23, %v829_v34  ;;  %v1918_v34 = vld [vmem:[#allocation11 + $0x30] sm:$0xff] }
 0x3b3   : > { %1120 = vmatpush.bf16.msrb.mxu1 %v1918_v34  ;;  %v1943_v34 = vld [vmem:[#allocation14 + $0x38] sm:$0xff] }
 0x3b4   : > { %v835_v36 = vmul.f32 1.442695, %v833_v35  ;;  %v1917_v35 = vld [vmem:[#allocation11 + $0x28] sm:$0xff] }
 0x3b6   : > { %2079 = vpow2.f32 %v835_v36  ;;  %v1916_v36 = vld [vmem:[#allocation11 + $0x20] sm:$0xff] }
 0x3b7   : > { %1121 = vmatpush.bf16.msrb.mxu1 %v1917_v35  ;;  %v1951_v35 = vld [vmem:[#allocation14 + $0x78] sm:$0xff] }
 0x3b9   : > { %v912_v37 = vpop.xlane.xlu2 %911  ;;  %v832_v38 = vpop.xlane.xlu0 %831 }
 0x3ba   : > { %v914_v39 = vsub.f32 %v904_v26, %v912_v37  ;;  %v834_v42 = vsub.f32 %v824_v27, %v832_v38  ;;  %v1915_v37 = vld [vmem:[#allocation11 + $0x18] sm:$0xff]  ;;  %v1914_v38 = vld [vmem:[#allocation11 + $0x10] sm:$0xff] }
 0x3bb   : > { %1122 = vmatpush.bf16.msrb.mxu1 %v1916_v36  ;;  %v1942_v36 = vld [vmem:[#allocation14 + $0x30] sm:$0xff] }
 0x3bc   : > { %v2080_v40 = vpop.eup %2079  ;;  %v917_v41 = vmul.f32 1.442695, %v914_v39  ;;  %v837_v45 = vmul.f32 1.442695, %v834_v42 }
 0x3bd   : > { %v839_v43 = vsel %vm751_vm1, %v2080_v40, 0.0 }
 0x3be   : > { %2081 = vpow2.f32 %v917_v41  ;;  %840 = vadd.xlane.f32.xlu1 %v839_v43  ;;  %v1912_v41 = vld [vmem:[#allocation11] sm:$0xff]  ;;  %v1813_v43 = vld [vmem:[#allocation12 + $0x70] sm:$0xf] }
 0x3bf   : > { %2083 = vpow2.f32 %v837_v45  ;;  %1123 = vmatpush.bf16.msrb.mxu1 %v1915_v37  ;;  %v1935_v45 = vld [vmem:[#allocation12 + $0x74] sm:$0xf0]  ;;  %v1950_v37 = vld [vmem:[#allocation14 + $0x70] sm:$0xff] }
 0x3c1   : > { %v989_v46 = vpop.xlane.xlu0 %988 }
 0x3c2   : > { %v993_v47 = vsub.f32 %v982_v30, %v989_v46  ;;  %v1934_v46 = vld [vmem:[#allocation12 + $0x74] sm:$0xf] }
 0x3c3   : > { %1124 = vmatpush.bf16.msrb.mxu1 %v1914_v38  ;;  %v1941_v38 = vld [vmem:[#allocation14 + $0x28] sm:$0xff] }
 0x3c4   : > { %v2082_v48 = vpop.eup %2081  ;;  %v995_v49 = vmul.f32 1.442695, %v993_v47  ;;  %v1814_v47 = vor.u32 %v1935_v45, %v1813_v43  ;;  %v2067_v43 = vld [vmem:[%s2770_s5] ss:$0 sm:$0xff] }
 0x3c5   : > { %v922_v50 = vsel %vm751_vm1, %v2082_v48, 0.0  ;;  %v2084_v52 = vpop.eup %2083 }
 0x3c6   : > { %2085 = vpow2.f32 %v995_v49  ;;  %923 = vadd.xlane.f32.xlu0 %v922_v50  ;;  %v842_v56 = vsel %vm751_vm1, %v2084_v52, 0.0  ;;  %v1805_v49 = vld [vmem:[#allocation12 + $0x60] sm:$0xf]  ;;  %v1933_v50 = vld [vmem:[#allocation12 + $0x64] sm:$0xf0] }
 0x3c9   : > { %v992_v51 = vpop.xlane.xlu2 %991 }
 0x3ca   : > { %v994_v53 = vsub.f32 %v984_v32, %v992_v51 }
 0x3cc   : > { %v2086_v54 = vpop.eup %2085  ;;  %v997_v55 = vmul.f32 1.442695, %v994_v53  ;;  %v1807_v53 = vld [vmem:[#allocation12 + $0x68] sm:$0xf0] }
 0x3cd   : > { %v999_v57 = vsel %vm751_vm1, %v2086_v54, 0.0 }
 0x3ce   : > { %2087 = vpow2.f32 %v997_v55  ;;  %843 = vadd.xlane.f32.xlu0 %v842_v56  ;;  %1000 = vadd.xlane.f32.xlu1 %v999_v57  ;;  %v1797_v56 = vld [vmem:[#allocation12 + $0x50] sm:$0xf]  ;;  %v1931_v57 = vld [vmem:[#allocation12 + $0x54] sm:$0xf0] }
 0x3d1   : > { %v851_v58 = vpop.permute.xlu2 %850 }
 0x3d2   : > { %863 = vmatpush.bf16.msrb.mxu0 %v851_v58 }
 0x3d4   : > { %v2088_v59 = vpop.eup %2087 }
 0x3d5   : > { %v1002_v60 = vsel %vm751_vm1, %v2088_v59, 0.0 }
 0x3d6   : > { %1003 = vadd.xlane.f32.xlu0 %v1002_v60  ;;  %v1799_v60 = vld [vmem:[#allocation12 + $0x58] sm:$0xf0] }
 0x3e7   : > { %930 = vrot.lane.b32.xlu1 %v2665_v44, %s2408_s28 }
 0x3ea   : > { %1010 = vrot.lane.b32.xlu0 %v2665_v44, %s2409_s11 }
 0x431   : > { %v841_v63 = vpop.xlane.xlu1 %840 }
 0x432   : > { %2089 = vrcp.f32 %v841_v63  ;;  %v1789_v63 = vld [vmem:[#allocation12 + $0x40] sm:$0xf] }
 0x438   : > { %v2090_v3 = vpop.eup %2089 }
 0x439   : > { %v924_v62 = vpop.xlane.xlu0 %923  ;;  %v847_v5 = vmul.f32 %v2090_v3, %v2080_v40  ;;  %v1913_v40 = vld [vmem:[#allocation11 + $0x8] sm:$0xff]  ;;  %v1928_v3 = vld [vmem:[#allocation12 + $0x44] sm:$0xf] }
 0x43a   : > { %1125 = vmatpush.bf16.msrb.mxu1 %v1913_v40  ;;  %v1940_v40 = vld [vmem:[#allocation14 + $0x20] sm:$0xff] }
 0x43e   : > { %1126 = vmatpush.bf16.msrb.mxu1 %v1912_v41  ;;  %v1948_v41 = vld [vmem:[#allocation14 + $0x60] sm:$0xff] }
 0x441   : > { %v844_v2 = vpop.xlane.xlu0 %843  ;;  %v1001_v9 = vpop.xlane.xlu1 %1000 }
 0x442   : > { %2091 = vrcp.f32 %v844_v2  ;;  %v1929_v2 = vld [vmem:[#allocation12 + $0x44] sm:$0xf0]  ;;  %1418 = vmatpush.bf16.msra.mxu1 %v1951_v35 }
 0x443   : > { %2093 = vrcp.f32 %v924_v62 }
 0x444   : > { %2095 = vrcp.f32 %v921_v61  ;;  %v1798_v61 = vor.u32 %v1931_v57, %v1797_v56  ;;  %v1945_v56 = vld [vmem:[#allocation14 + $0x48] sm:$0xff]  ;;  %v1936_v57 = vld [vmem:[#allocation14] sm:$0xff] }
 0x446   : > { %1419 = vmatpush.bf16.msra.mxu1 %v1950_v37 }
 0x448   : > { %v2092_v4 = vpop.eup %2091 }
 0x449   : > { %v848_v6 = vmul.f32 %v2092_v4, %v2084_v52  ;;  %v1004_v8 = vpop.xlane.xlu0 %1003  ;;  %v2094_v44 = vpop.eup %2093  ;;  %v1932_v52 = vld [vmem:[#allocation12 + $0x64] sm:$0xf]  ;;  %v1791_v4 = vld [vmem:[#allocation12 + $0x48] sm:$0xf0] }
 0x44a   : > { %2097 = vrcp.f32 %v1004_v8  ;;  %v2096_v10 = vpop.eup %2095  ;;  %v928_v12 = vmul.f32 %v2094_v44, %v2082_v48  ;;  %v1815_v48 = vld [vmem:[#allocation12 + $0x78] sm:$0xf0]  ;;  %v1810_v55 = vor.u32 %v1932_v52, %v1807_v53  ;;  %v1938_v53 = vld [vmem:[#allocation14 + $0x10] sm:$0xff] }
 0x44b   : > { %v849_v7 = vpack.c.bf16 %v848_v6, %v847_v5  ;;  %2099 = vrcp.f32 %v1001_v9  ;;  %v927_v14 = vmul.f32 %v2096_v10, %v2684_v22  ;;  %v1818_v51 = vor.u32 %v1934_v46, %v1815_v48  ;;  %v1781_v10 = vld [vmem:[#allocation12 + $0x30] sm:$0xf]  ;;  %v1947_v52 = vld [vmem:[#allocation14 + $0x58] sm:$0xff] }
 0x44c   : > { %v1790_v6 = vor.u32 %v1929_v2, %v1789_v63 }
 0x44d   : > { %1714 = vmatmul.msk.bf16.vlgmr.msrb.gmra.mxu0 %vm751_vm1, %v849_v7  ;;  %v929_v17 = vpack.c.bf16 %v928_v12, %v927_v14  ;;  %1252 = vmatpush.bf16.msra.mxu3 %v1818_v51  ;;  %v1794_v7 = vor.u32 %v1928_v3, %v1791_v4  ;;  %v1926_v12 = vld [vmem:[#allocation12 + $0x34] sm:$0xf]  ;;  %v1783_v14 = vld [vmem:[#allocation12 + $0x38] sm:$0xf0] }
 0x44e   : > { %v1939_v51 = vld [vmem:[#allocation14 + $0x18] sm:$0xff] }
 0x450   : > { %v2098_v11 = vpop.eup %2097 }
 0x451   : > { %v2100_v13 = vpop.eup %2099  ;;  %v1008_v16 = vmul.f32 %v2098_v11, %v2088_v59  ;;  %v1930_v59 = vld [vmem:[#allocation12 + $0x54] sm:$0xf]  ;;  %1253 = vmatpush.bf16.msra.mxu3 %v1810_v55  ;;  %v1927_v11 = vld [vmem:[#allocation12 + $0x34] sm:$0xf0]  ;;  %v1937_v55 = vld [vmem:[#allocation14 + $0x8] sm:$0xff] }
 0x452   : > { %v1007_v18 = vmul.f32 %v2100_v13, %v2086_v54  ;;  %v1806_v54 = vor.u32 %v1933_v50, %v1805_v49  ;;  %v1802_v62 = vor.u32 %v1930_v59, %v1799_v60  ;;  %v1782_v13 = vor.u32 %v1927_v11, %v1781_v10  ;;  %v2068_v11 = vld [vmem:[%s2774_s9] ss:$0 sm:$0xff] }
 0x454   : > { %v1009_v20 = vpack.c.bf16 %v1008_v16, %v1007_v18  ;;  %v1773_v16 = vld [vmem:[#allocation12 + $0x20] sm:$0xf]  ;;  %v1924_v18 = vld [vmem:[#allocation12 + $0x24] sm:$0xf] }
 0x455   : > { %1254 = vmatpush.bf16.msra.mxu3 %v1802_v62 }
 0x459   : > { %v931_v15 = vpop.permute.xlu1 %930  ;;  %1255 = vmatpush.bf16.msra.mxu3 %v1794_v7 }
 0x45a   : > { %943 = vmatpush.bf16.msra.mxu2 %v931_v15  ;;  %v1786_v15 = vor.u32 %v1926_v12, %v1783_v14 }
 0x45c   : > { %v1011_v19 = vpop.permute.xlu0 %1010 }
 0x45d   : > { %1716 = vmatmul.msk.bf16.vlgmr.msra.gmra.mxu2 %vm751_vm1, %v929_v17  ;;  %1023 = vmatpush.bf16.msra.mxu0 %v1011_v19  ;;  %v1925_v17 = vld [vmem:[#allocation12 + $0x24] sm:$0xf0] }
 0x45e   : > { %1238 = vmatpush.bf16.msrb.mxu2 %v1814_v47  ;;  %1256 = vmatpush.bf16.msra.mxu3 %v1786_v15  ;;  %v1774_v19 = vor.u32 %v1925_v17, %v1773_v16 }
 0x460   : > { %1718 = vmatmul.msk.bf16.vlgmr.msra.gmra.mxu0 %vm751_vm1, %v1009_v20  ;;  %v1775_v20 = vld [vmem:[#allocation12 + $0x28] sm:$0xf0] }
 0x461   : > { %1404 = vmatpush.bf16.msrb.mxu0 %v1943_v34 }
 0x462   : > { %1239 = vmatpush.bf16.msrb.mxu2 %v1806_v54  ;;  %v1946_v54 = vld [vmem:[#allocation14 + $0x50] sm:$0xff] }
 0x465   : > { %1405 = vmatpush.bf16.msrb.mxu0 %v1942_v36 }
 0x466   : > { %1240 = vmatpush.bf16.msrb.mxu2 %v1798_v61 }
 0x469   : > { %1406 = vmatpush.bf16.msrb.mxu0 %v1941_v38 }
 0x46a   : > { %1241 = vmatpush.bf16.msrb.mxu2 %v1790_v6 }
 0x46d   : > { %1407 = vmatpush.bf16.msrb.mxu0 %v1940_v40 }
 0x46e   : > { %1242 = vmatpush.bf16.msrb.mxu2 %v1782_v13 }
 0x471   : > { %1408 = vmatpush.bf16.msrb.mxu0 %v1939_v51 }
 0x472   : > { %1243 = vmatpush.bf16.msrb.mxu2 %v1774_v19 }
 0x475   : > { %1409 = vmatpush.bf16.msrb.mxu0 %v1938_v53 }
 0x479   : > { %1410 = vmatpush.bf16.msrb.mxu0 %v1937_v55 }
 0x47d   : > { %1411 = vmatpush.bf16.msrb.mxu0 %v1936_v57 }
 0x4ca   : > { %v865_v21 = vpop.f32.mrf.mxu0 }
 0x4cb   : > { %v870_v28 = vpack.c.bf16 %v865_v21, %v865_v21  ;;  %v1778_v21 = vor.u32 %v1924_v18, %v1775_v20 }
 0x4cd   : > { %1257 = vmatpush.bf16.msra.mxu3 %v1778_v21 }
 0x4d2   : > { %v867_v23 = vpop.f32.mrf.mxu0 }
 0x4d3   : > { %v871_v30 = vpack.c.bf16 %v867_v23, %v867_v23  ;;  %v1765_v23 = vld [vmem:[#allocation12 + $0x10] sm:$0xf] }
 0x4dd   : > { %v1025_v24 = vpop.f32.mrf.mxu0 }
 0x4de   : > { %v1030_v25 = vpack.c.bf16 %v1025_v24, %v1025_v24  ;;  %v1923_v24 = vld [vmem:[#allocation12 + $0x14] sm:$0xf0] }
 0x4e0   : > { %v945_v26 = vpop.f32.mrf.mxu2  ;;  %1034 = vrot.lane.b32.xlu1 %v1030_v25, %s2407_s19  ;;  %v1922_v25 = vld [vmem:[#allocation12 + $0x14] sm:$0xf] }
 0x4e1   : > { %v950_v22 = vpack.c.bf16 %v945_v26, %v945_v26  ;;  %v1766_v26 = vor.u32 %v1923_v24, %v1765_v23 }
 0x4e3   : > { %954 = vrot.lane.b32.xlu2 %v950_v22, %s2408_s28  ;;  %v1767_v22 = vld [vmem:[#allocation12 + $0x18] sm:$0xf0]  ;;  %1244 = vmatpush.bf16.msrb.mxu2 %v1766_v26 }
 0x4e5   : > { %v1027_v31 = vpop.f32.mrf.mxu0 }
 0x4e6   : > { %v1031_v32 = vpack.c.bf16 %v1027_v31, %v1027_v31 }
 0x4e8   : > { %v947_v27 = vpop.f32.mrf.mxu2 }
 0x4e9   : > { %v951_v29 = vpack.c.bf16 %v947_v27, %v947_v27  ;;  %v1770_v27 = vor.u32 %v1922_v25, %v1767_v22 }
 0x4eb   : > { %956 = vrot.lane.b32.xlu0 %v951_v29, %s2408_s28  ;;  %874 = vrot.lane.b32.xlu2 %v870_v28, %s2409_s11  ;;  %v1757_v28 = vld [vmem:[#allocation12] sm:$0xf]  ;;  %v1921_v29 = vld [vmem:[#allocation12 + $0x4] sm:$0xf0] }
 0x4ec   : > { %1258 = vmatpush.bf16.msra.mxu3 %v1770_v27  ;;  %v1758_v31 = vor.u32 %v1921_v29, %v1757_v28 }
 0x4ee   : > { %1245 = vmatpush.bf16.msrb.mxu2 %v1758_v31 }
 0x4f3   : > { %876 = vrot.lane.b32.xlu2 %v871_v30, %s2409_s11  ;;  %v1920_v30 = vld [vmem:[#allocation12 + $0x4] sm:$0xf] }
 0x4fb   : > { %1036 = vrot.lane.b32.xlu2 %v1031_v32, %s2407_s19  ;;  %v1759_v32 = vld [vmem:[#allocation12 + $0x8] sm:$0xf0]  ;;  %s2331_s19 = scalar_lea.hbm %s2775_s10, 32 }
 0x4fc   : > { %v1762_v33 = vor.u32 %v1920_v30, %v1759_v32  ;;  %p2333_p10 = scmp.lt.s32.totalorder %s2331_s19, %s2327_s24 }
 0x4fe   : > { %1259 = vmatpush.bf16.msra.mxu3 %v1762_v33  ;;  %p2334_p2 = por %p2333_p10, %p2332_p9 }
 0x500   : > { %p2335_p11 = pnand %p2334_p2, %p2330_p8 }
 0x53d   : > { %v955_v39 = vpop.permute.xlu2 %954 }
 0x545   : > { %v875_v42 = vpop.permute.xlu2 %874 }
 0x546   : > { %881 = vst.msk [vmem:[#allocation2] sm:$0xf] %vm880_vm3, %v875_v42 }
 0x547   : > { %961 = vst.msk [vmem:[#allocation2] sm:$0xf] %vm960_vm4, %v955_v39  ;;  %v1949_v39 = vld [vmem:[#allocation14 + $0x68] sm:$0xff] }
 0x548   : > { %1420 = vmatpush.bf16.msra.mxu1 %v1949_v39 }
 0x54c   : > { %1421 = vmatpush.bf16.msra.mxu1 %v1948_v41 }
 0x54d   : > { %v877_v58 = vpop.permute.xlu2 %876 }
 0x54e   : > { %882 = vst.msk [vmem:[#allocation2 + $0x4] sm:$0xf] %vm880_vm3, %v877_v58  ;;  %v1944_v58 = vld [vmem:[#allocation14 + $0x40] sm:$0xff] }
 0x550   : > { %1422 = vmatpush.bf16.msra.mxu1 %v1947_v52 }
 0x552   : > { %v1035_v5 = vpop.permute.xlu1 %1034 }
 0x553   : > { %1041 = vst.msk [vmem:[#allocation2] sm:$0xf] %vm1040_vm5, %v1035_v5 }
 0x554   : > { %1423 = vmatpush.bf16.msra.mxu1 %v1946_v54 }
 0x555   : > { %v1037_v9 = vpop.permute.xlu2 %1036 }
 0x558   : > { %1424 = vmatpush.bf16.msra.mxu1 %v1945_v56 }
 0x55c   : > { %1425 = vmatpush.bf16.msra.mxu1 %v1944_v58 }
 0x55d   : > { %v957_v8 = vpop.permute.xlu0 %956 }
 0x55e   : > { %962 = vst.msk [vmem:[#allocation2 + $0x4] sm:$0xf] %vm960_vm4, %v957_v8 }
 0x55f   : > { %1042 = vst.msk [vmem:[#allocation2 + $0x4] sm:$0xf] %vm1040_vm5, %v1037_v9 }
 0x566   : > { %v1911_v44 = vld [vmem:[#allocation2] sm:$0xff] }
 0x567   : > { %1127 = vmatmul.bf16.vlgmr.msrb.gmra.mxu1 %v1911_v44 }
 0x5e4   : > { %v1128_v42 = vpop.f32.mrf.mxu1 }
 0x5e5   : > { %v1129_v45 = vadd.f32 %v2067_v43, %v1128_v42 }
 0x5e7   : > { %v1133_v48 = vadd.f32 %v1129_v45, %v2655_v0  ;;  %v1152_v0 = vld [vmem:[%s2772_s7] sm:$0x3] }
 0x5e8   : > { %v1154_v60 = vperm.slane %v1152_v0, 0  ;;  %v1155_v61 = vperm.slane %v1152_v0, 1 }
 0x5ec   : > { %v1130_v46 = vpop.f32.mrf.mxu1 }
 0x5ed   : > { %v1131_v47 = vadd.f32 %v2067_v43, %v1130_v46 }
 0x5ef   : > { %v1134_v49 = vadd.f32 %v1131_v47, %v2657_v1 }
 0x5f1   : > { %v1135_v50 = vpack.c.bf16 %v1134_v49, %v1133_v48 }
 0x5f3   : > { %1246 = vmatmul.bf16.vlgmr.msrb.gmra.mxu2 %v1135_v50  ;;  %1260 = vmatmul.bf16.vlgmr.msra.gmra.mxu3 %v1135_v50 }
 0x676   : > { %v1247_v1 = vpop.f32.mrf.mxu2  ;;  %v1261_v59 = vpop.f32.mrf.mxu3 }
 0x677   : > { %v1248_v62 = vadd.f32 %v1247_v1, %v1154_v60  ;;  %v1262_v63 = vadd.f32 %v1261_v59, %v1155_v61 }
 0x679   : > { %v1266_v6 = vmax.f32 %v1248_v62, 0.0  ;;  %v1267_v7 = vmax.f32 %v1262_v63, 0.0 }
 0x67e   : > { %v1249_v2 = vpop.f32.mrf.mxu2  ;;  %v1263_v3 = vpop.f32.mrf.mxu3 }
 0x67f   : > { %v1250_v4 = vadd.f32 %v1249_v2, %v1154_v60  ;;  %v1264_v5 = vadd.f32 %v1263_v3, %v1155_v61 }
 0x681   : > { %v1268_v8 = vmax.f32 %v1250_v4, 0.0  ;;  %v1269_v9 = vmax.f32 %v1264_v5, 0.0 }
 0x683   : > { %v1270_v44 = vpack.c.bf16 %v1268_v8, %v1266_v6  ;;  %v1271_v10 = vpack.c.bf16 %v1269_v9, %v1267_v7 }
 0x685   : > { %1412 = vmatmul.bf16.vlgmr.msrb.gmra.mxu0 %v1270_v44  ;;  %1426 = vmatmul.bf16.vlgmr.msra.gmra.mxu1 %v1271_v10 }
 0x702   : > { %v1413_v12 = vpop.f32.mrf.mxu0  ;;  %v1427_v13 = vpop.f32.mrf.mxu1 }
 0x703   : > { %v1414_v14 = vadd.f32 %v2068_v11, %v1413_v12 }
 0x705   : > { %v1428_v15 = vadd.f32 %v1427_v13, %v1414_v14 }
 0x707   : > { %v1432_v16 = vadd.f32 %v1428_v15, %v1133_v48 }
 0x709   : > { %1434 = vst [vmem:[%s499_s21] sm:$0xff] %v1432_v16 }
 0x70a   : > { %v1415_v17 = vpop.f32.mrf.mxu0  ;;  %v1429_v19 = vpop.f32.mrf.mxu1 }
 0x70b   : > { %v1416_v18 = vadd.f32 %v2068_v11, %v1415_v17 }
 0x70d   : > { %v1430_v20 = vadd.f32 %v1429_v19, %v1416_v18 }
 0x70f   : > { %v1433_v21 = vadd.f32 %v1430_v20, %v1134_v49 }
 0x711   : > { %1435 = vst [vmem:[%s499_s21 + $0x8] sm:$0xff] %v1433_v21 }
 0x712   : > { %2338 = shalt.err (!%p2335_p11)
}
 0x713   : > { %s2410_s13 = smov 128   ;;  %s2411_s26 = smov 256  }
 0x714   : > { %s2412_s27 = smov 8  }
 0x715   : > { %1976 = dma.vmem_to_hbm [thread:$0]  (%p2564_p7), %s1449_s0, 256, %s1451_s3, %s1437_s4, %s2410_s13, %s2411_s26, %s2412_s27  }
 0x716 PF: > { %s2807_s20 = sld [smem:[#allocation22_spill]]  ;;  %p2809_p12 = scmp.ge.s32.totalorder %s2393_s16, 2 }
 0x718   : > { %p2002_p13 = pnand %p2809_p12, %p2503_p6 }
 0x71a   : > { %p2003_p0 = pneg %p2002_p13 }
 0x71c   : > { %s1465_s2 = sand.u32 1, %s2807_s20  }
 0x71d   : > { %s1466_s23 = scalar_lea.sflag [#allocation5], %s1465_s2 }
 0x71e   : > { %2376 = dma.done.wait (%p2003_p0), %s1466_s23, 256  }
 0x71f   : > { %2378 = vsyncadd (%p2003_p0), %s1466_s23, 4294967040  ;;  %s2810_s12 = sld [smem:[#allocation23_spill]]  ;;  %p28_p3 = scmp.ge.s32.totalorder %s2550_s25, 4  }
 0x720   : > { %s2811_s15 = sld [smem:[#allocation25_spill]]  ;;  %s2812_s13 = smov %s2385_s14 }
 0x721   : > { %s2814_s16 = smov %s2550_s25  ;;  %30 = sbr.rel (!%p28_p3) target bundleno = 16 (0x10), region = 138 }
 0x725   : > { %s2813_s14 = smov %s2810_s12 }
 0x726   :  { %1472 = vsyncpa [#allocation4], 1 }
 0x727   :  { %1474 = vsyncpa [#allocation4 + $0x1], 1 }
 0x728   :  { %1475 = vsyncpa [#allocation7], 1 }
 0x729   :  { %1477 = vsyncpa [#allocation7 + $0x1], 1 }
 0x72a   :  { %1478 = vsyncpa [#allocation10], 1 }
 0x72b   :  { %1479 = vsyncpa [#allocation13], 1 }
 0x72c   :  { %1480 = vsyncpa [#allocation5], 1 }
 0x72d   :  { %1482 = vsyncpa [#allocation5 + $0x1], 1 }

</bundles_post_ra>
